<compile_context>
chip_gen: v5e
topology: v5e:2x2
jax: 0.10.0
libtpu: 0.0.40
codegen_flags: <defaults>
</compile_context>

<pallas_src>
import jax
import jax.numpy as jnp
from jax import lax
from jax.experimental import pallas as pl
from jax.experimental.pallas import tpu as pltpu


def aux_head_kernel(x_ref, w1_ref, b1_ref, w2_ref, b2_ref, wl_ref, bl_ref, out_ref):
    tn = x_ref.shape[0]
    c = x_ref.shape[3]

    # Stage 1: ReLU directly in the storage dtype (bf16 in; exact for ReLU, no
    # f32 upcast round-trip).  x arrives NHWC so C sits on the lane axis.
    x = jnp.maximum(x_ref[...], 0)

    if c >= 128:
        # Pool first (lane-dense over C), then a single (4*tn, C) @ (C, 128)
        # matmul: 16x fewer conv1 MXU FLOPs and no (tn*64, 128) f32 temporary.
        # H window sums (rows 0..4 / 3..7) accumulated in f32 via slice adds.
        r_top = x[:, 0].astype(jnp.float32)                       # (tn, 8, C)
        r_bot = x[:, 3].astype(jnp.float32)
        for k in range(1, 5):
            r_top = r_top + x[:, k].astype(jnp.float32)
            r_bot = r_bot + x[:, 3 + k].astype(jnp.float32)
        taps = []
        for rows in (r_top, r_bot):                               # kh = 0, 1
            for ws in (slice(0, 5), slice(3, 8)):                 # kw = 0, 1
                taps.append(jnp.sum(rows[:, ws, :], axis=1))      # (tn, C)
        pooled = jnp.concatenate(taps, axis=0).astype(jnp.bfloat16)   # (4*tn, C)
        h = jnp.dot(pooled, w1_ref[...],
                    preferred_element_type=jnp.float32)           # (4*tn, 128)
        # Back to tap-major (tn, 512) to match w2's (kh, kw, cin) row layout.
        hcat = jnp.concatenate([h[t * tn:(t + 1) * tn] for t in range(4)], axis=-1)
    else:
        # Lane-sparse C: 1x1 conv first as one (tn*64, C) @ (C, 128) matmul
        # (pool and conv are both linear; ReLU is already applied), then pool the
        # lane-dense 128-wide activations with window SUMS (1/25 and BN1 scale
        # are pre-folded into w1, BN1 bias added after pooling).
        h = jnp.dot(x.reshape(tn * 64, c), w1_ref[...],
                    preferred_element_type=jnp.float32)           # (tn*64, 128)
        h4 = h.reshape(tn, 8, 8, 128)                             # (N, H, W, 128)
        r_top = jnp.sum(h4[:, 0:5], axis=1)                       # (tn, 8, 128)
        r_bot = jnp.sum(h4[:, 3:8], axis=1)
        taps = []
        for rows in (r_top, r_bot):                               # kh = 0, 1
            for ws in (slice(0, 5), slice(3, 8)):                 # kw = 0, 1
                taps.append(jnp.sum(rows[:, ws, :], axis=1))      # (tn, 128)
        hcat = jnp.concatenate(taps, axis=-1)                     # (tn, 512)

    # BN1 bias + ReLU, then conv2 (2x2 over the 2x2 map) as one K=512 matmul.
    hcat = jnp.maximum(hcat + b1_ref[...], 0.0).astype(jnp.bfloat16)
    h2 = jnp.dot(hcat, w2_ref[...], preferred_element_type=jnp.float32)    # (tn, 768)

    # BN2 bias + ReLU, then the lane-padded classifier.
    h2 = jnp.maximum(h2 + b2_ref[...], 0.0).astype(jnp.bfloat16)
    out_ref[...] = (jnp.dot(h2, wl_ref[...], preferred_element_type=jnp.float32)
                    + bl_ref[...])


def _pick_tile_n(n, c, ncp, vmem_limit, tile_n_max):
    """Largest batch tile (multiple of 8) that fits the VMEM budget and keeps at
    least two grid blocks (so v7x's two TensorCores both get work)."""
    # Grid-invariant operands (double-buffered by the pipeline; no Buffered(1) to
    # keep the call maximally portable -- the ~2 MiB is accounted for here).
    fixed = 2 * ((c * 128 + 512 * 768 + 768 * ncp) * 2 + (512 + 768 + ncp) * 4)
    # Per-batch-row bytes: double-buffered bf16 x block + f32 out block + the
    # dominant in-kernel temporaries of the respective path.
    x_row = 64 * c * 2
    if c >= 128:
        tmp_row = (64 * c * 2            # ReLU'd bf16 copy of x
                   + 2 * 8 * c * 4       # f32 H-row sums (top/bottom)
                   + 8 * c * 4           # f32 upcast slice
                   + 5 * c * 4           # W-window slice
                   + 4 * c * 4 + 4 * c * 2     # f32 taps + bf16 pooled
                   + 4 * 128 * 4 + 512 * 10 + 768 * 6 + ncp * 4)
    else:
        tmp_row = (64 * c * 2            # ReLU'd bf16 copy of x
                   + 2 * 64 * 128 * 4    # f32 conv1 output (+ reshape copy)
                   + 2 * 8 * 128 * 4     # f32 H-row sums
                   + 512 * 10 + 768 * 6 + ncp * 4)
    per_row = 2 * x_row + 2 * ncp * 4 + tmp_row
    budget = int(vmem_limit * 0.6) - fixed           # headroom for compiler scratch
    cap = max(8, (budget // per_row) // 8 * 8)
    two_blocks = max(8, ((n + 1) // 2 + 7) // 8 * 8)  # >= 2 grid blocks when possible
    n_up = ((n + 7) // 8) * 8
    tile = min(tile_n_max, cap, two_blocks, n_up)
    return max(8, (tile // 8) * 8)


def aux_head_forward(x_nchw, params, *, tile_n=512):
    n, c, hh, ww = x_nchw.shape
    assert (hh, ww) == (8, 8), "AuxiliaryHeadCIFAR assumes 8x8 spatial input"
    num_classes = params["wl"].shape[0]
    eps = 1e-5

    # NCHW -> NHWC fused with the bf16 cast: one read-f32 / write-bf16 pass over x.
    # The kernel's conv1 operand is bf16 anyway and ReLU is exact in bf16, so this
    # halves the per-step DMA of the memory-bound kernel.
    x_nhwc = jnp.transpose(x_nchw, (0, 2, 3, 1)).astype(jnp.bfloat16)

    # Fold BatchNorm (eval mode) scales into the conv weights; keep only biases.
    inv1 = params["g1"] / jnp.sqrt(params["v1"] + eps)              # (128,)
    inv2 = params["g2"] / jnp.sqrt(params["v2"] + eps)              # (768,)
    b1 = params["beta1"] - params["m1"] * inv1                      # (128,)
    b2 = params["beta2"] - params["m2"] * inv2                      # (768,)

    # conv1 1x1: (128, C, 1, 1) -> (C, 128); fold BN1 scale and the 1/25 pool divisor.
    w1 = (params["w1"].reshape(128, c).T * inv1[None, :]) / 25.0
    # conv2 2x2: (768, 128, 2, 2) -> (kh, kw, cin, cout) -> (512, 768); fold BN2 scale.
    w2 = jnp.transpose(params["w2"], (2, 3, 1, 0)).reshape(512, 768) * inv2[None, :]
    # Classifier, zero-padded to a lane-dense output width (multiple of 128).
    ncp = 128 * ((num_classes + 127) // 128)
    wl = jnp.zeros((768, ncp), jnp.float32).at[:, :num_classes].set(params["wl"].T)
    bl = jnp.zeros((1, ncp), jnp.float32).at[0, :num_classes].set(params["bl"])

    b1_t = jnp.tile(b1, 4).reshape(1, 512)     # matches tap-major hcat layout
    b2_r = b2.reshape(1, 768)

    # bf16 MXU operands (f32 accumulation in-kernel); biases stay f32.
    w1 = w1.astype(jnp.bfloat16)
    w2 = w2.astype(jnp.bfloat16)
    wl = wl.astype(jnp.bfloat16)

    # VMEM budget: 64 MiB limit on 128 MiB parts (v5e/v6e), <= 40 MiB on v7x's
    # 64 MiB-per-TensorCore parts; conservative fallback if the query fails.
    try:
        vmem_cap = int(pltpu.get_tpu_info().vmem_capacity_bytes)
    except Exception:
        vmem_cap = 64 * 1024 * 1024
    vmem_limit = max(32 * 1024 * 1024, min(64 * 1024 * 1024, (vmem_cap * 5) // 8))

    tile_n = _pick_tile_n(n, c, ncp, vmem_limit, tile_n)
    if tile_n >= n:
        tile_n = n                      # single block; block extents == array extents
    n_blocks = pl.cdiv(n, tile_n)
    n_pad = n_blocks * tile_n
    # No jnp.pad over x (a full extra HBM pass): if the last block is partial, its
    # out-of-bounds rows hold garbage that only reaches output rows sliced off below.

    flops = 2 * n * ((4 if c >= 128 else 64) * c * 128 + 512 * 768 + 768 * ncp)
    bytes_accessed = (x_nhwc.size * x_nhwc.dtype.itemsize
                      + (w1.size + w2.size + wl.size) * 2
                      + (b1_t.size + b2_r.size + bl.size) * 4
                      + n_pad * ncp * 4)

    out = pl.pallas_call(
        aux_head_kernel,
        out_shape=jax.ShapeDtypeStruct((n_pad, ncp), jnp.float32),
        grid=(n_blocks,),
        in_specs=[
            pl.BlockSpec((tile_n, 8, 8, c), lambda i: (i, 0, 0, 0)),   # x tile (bf16)
            pl.BlockSpec((c, 128), lambda i: (0, 0)),                  # w1 (BN1, /25 folded)
            pl.BlockSpec((1, 512), lambda i: (0, 0)),                  # b1 (tiled x4)
            pl.BlockSpec((512, 768), lambda i: (0, 0)),                # w2 (fused taps)
            pl.BlockSpec((1, 768), lambda i: (0, 0)),                  # b2
            pl.BlockSpec((768, ncp), lambda i: (0, 0)),                # wl (lane-padded)
            pl.BlockSpec((1, ncp), lambda i: (0, 0)),                  # bl (lane-padded)
        ],
        out_specs=pl.BlockSpec((tile_n, ncp), lambda i: (i, 0)),
        compiler_params=pltpu.CompilerParams(
            dimension_semantics=("parallel",),
            vmem_limit_bytes=vmem_limit),
        cost_estimate=pl.CostEstimate(flops=flops, transcendentals=0,
                                      bytes_accessed=bytes_accessed),
    )(x_nhwc, w1, b1_t, w2, b2_r, wl, bl)

    return out[:n, :num_classes]


def ref_forward(x, params):
    """Pure-JAX f32 reference matching the PyTorch module (eval-mode BN)."""
    eps = 1e-5

    def bn(y, g, b, m, v):
        return ((y - m[None, :, None, None]) / jnp.sqrt(v + eps)[None, :, None, None]
                * g[None, :, None, None] + b[None, :, None, None])

    r = jnp.maximum(x, 0.0)
    pooled = lax.reduce_window(r, 0.0, lax.add, (1, 1, 5, 5), (1, 1, 3, 3), "VALID") / 25.0
    h = lax.conv_general_dilated(pooled, params["w1"], (1, 1), "VALID",
                                 dimension_numbers=("NCHW", "OIHW", "NCHW"))
    h = jnp.maximum(bn(h, params["g1"], params["beta1"], params["m1"], params["v1"]), 0.0)
    h = lax.conv_general_dilated(h, params["w2"], (1, 1), "VALID",
                                 dimension_numbers=("NCHW", "OIHW", "NCHW"))
    h = jnp.maximum(bn(h, params["g2"], params["beta2"], params["m2"], params["v2"]), 0.0)
    flat = h.reshape(h.shape[0], -1)                     # (N, 768, 1, 1) -> (N, 768)
    return flat @ params["wl"].T + params["bl"]


if __name__ == "__main__":
    key = jax.random.PRNGKey(0)
    N, C, NUM_CLASSES = 2, 4, 10
    keys = jax.random.split(key, 12)

    x = jax.random.normal(keys[0], (N, C, 8, 8), jnp.float32)

    # Deterministic synthetic parameters (shapes match the nn.Module __init__).
    params = dict(
        w1=jax.random.normal(keys[1], (128, C, 1, 1), jnp.float32) * 0.1,
        w2=jax.random.normal(keys[2], (768, 128, 2, 2), jnp.float32) * 0.05,
        wl=jax.random.normal(keys[3], (NUM_CLASSES, 768), jnp.float32) * 0.05,
        bl=jax.random.normal(keys[4], (NUM_CLASSES,), jnp.float32) * 0.05,
        g1=1.0 + 0.1 * jax.random.normal(keys[5], (128,), jnp.float32),
        beta1=0.1 * jax.random.normal(keys[6], (128,), jnp.float32),
        m1=0.1 * jax.random.normal(keys[7], (128,), jnp.float32),
        v1=jax.random.uniform(keys[8], (128,), jnp.float32, minval=0.5, maxval=1.5),
        g2=1.0 + 0.1 * jax.random.normal(keys[9], (768,), jnp.float32),
        beta2=0.1 * jax.random.normal(keys[10], (768,), jnp.float32),
        m2=jnp.zeros((768,), jnp.float32),
        v2=jax.random.uniform(keys[11], (768,), jnp.float32, minval=0.5, maxval=1.5),
    )

    out = jax.jit(aux_head_forward)(x, params)
    out = jax.block_until_ready(out)

    ref = ref_forward(x, params)
    assert out.shape == (N, NUM_CLASSES)
    # bf16 MXU operands with f32 accumulation -> compare with a bf16-appropriate tolerance.
    assert jnp.allclose(out, ref, atol=2e-2, rtol=2e-2), (
        float(jnp.max(jnp.abs(out - ref))), out, ref)
    print("KERNEL_OK")
</pallas_src>

<mosaic_0001>
module attributes {stable_mosaic.version = 11 : i64} {
  func.func @aux_head_kernel(%arg0: i32, %arg1: memref<2x8x8x4xbf16, #tpu.memory_space<vmem>>, %arg2: memref<4x128xbf16, #tpu.memory_space<vmem>>, %arg3: memref<1x512xf32, #tpu.memory_space<vmem>>, %arg4: memref<512x768xbf16, #tpu.memory_space<vmem>>, %arg5: memref<1x768xf32, #tpu.memory_space<vmem>>, %arg6: memref<768x128xbf16, #tpu.memory_space<vmem>>, %arg7: memref<1x128xf32, #tpu.memory_space<vmem>>, %arg8: memref<2x128xf32, #tpu.memory_space<vmem>>) attributes {dimension_semantics = [#tpu.dimension_semantics<parallel>], iteration_bounds = array<i64: 1>, scalar_prefetch = 0 : i64, scratch_operands = 0 : i64, tpu.core_type = #tpu.core_type<tc>, window_params = [{transform_indices = @transform_0, window_bounds = array<i64: 2, 8, 8, 4>}, {pipeline_mode = #tpu.pipeline_mode<synchronous>, transform_indices = @transform_1, window_bounds = array<i64: 4, 128>}, {pipeline_mode = #tpu.pipeline_mode<synchronous>, transform_indices = @transform_2, window_bounds = array<i64: 1, 512>}, {pipeline_mode = #tpu.pipeline_mode<synchronous>, transform_indices = @transform_3, window_bounds = array<i64: 512, 768>}, {pipeline_mode = #tpu.pipeline_mode<synchronous>, transform_indices = @transform_4, window_bounds = array<i64: 1, 768>}, {pipeline_mode = #tpu.pipeline_mode<synchronous>, transform_indices = @transform_5, window_bounds = array<i64: 768, 128>}, {pipeline_mode = #tpu.pipeline_mode<synchronous>, transform_indices = @transform_6, window_bounds = array<i64: 1, 128>}, {transform_indices = @transform_7, window_bounds = array<i64: 2, 128>}]} {
    %c0 = arith.constant 0 : index
    %c0_0 = arith.constant 0 : index
    %c0_1 = arith.constant 0 : index
    %c0_2 = arith.constant 0 : index
    %0 = vector.load %arg1[%c0, %c0_0, %c0_1, %c0_2] : memref<2x8x8x4xbf16, #tpu.memory_space<vmem>>, vector<2x8x8x4xbf16>
    %cst = arith.constant 0.000000e+00 : bf16
    %1 = vector.broadcast %cst : bf16 to vector<2x8x8x4xbf16>
    %2 = arith.maximumf %0, %1 : vector<2x8x8x4xbf16>
    %3 = vector.shape_cast %2 : vector<2x8x8x4xbf16> to vector<128x4xbf16>
    %c0_3 = arith.constant 0 : index
    %c0_4 = arith.constant 0 : index
    %4 = vector.load %arg2[%c0_3, %c0_4] : memref<4x128xbf16, #tpu.memory_space<vmem>>, vector<4x128xbf16>
    %cst_5 = arith.constant dense<0.000000e+00> : vector<128x128xf32>
    %5 = tpu.matmul %3, %4, %cst_5 {dimension_numbers = #tpu.dot_dimension_numbers<[1], [0], [0], [1], [0, 0, 1, 1], [], []>} : vector<128x4xbf16>, vector<4x128xbf16>, vector<128x128xf32> -> vector<128x128xf32>
    %6 = vector.shape_cast %5 : vector<128x128xf32> to vector<2x8x8x128xf32>
    %7 = vector.extract_strided_slice %6 {offsets = [0, 0, 0, 0], sizes = [2, 5, 8, 128], strides = [1, 1, 1, 1]} : vector<2x8x8x128xf32> to vector<2x5x8x128xf32>
    %cst_6 = arith.constant dense<0.000000e+00> : vector<2x8x128xf32>
    %8 = vector.multi_reduction <add>, %7, %cst_6 [1] : vector<2x5x8x128xf32> to vector<2x8x128xf32>
    %9 = vector.extract_strided_slice %6 {offsets = [0, 3, 0, 0], sizes = [2, 5, 8, 128], strides = [1, 1, 1, 1]} : vector<2x8x8x128xf32> to vector<2x5x8x128xf32>
    %cst_7 = arith.constant dense<0.000000e+00> : vector<2x8x128xf32>
    %10 = vector.multi_reduction <add>, %9, %cst_7 [1] : vector<2x5x8x128xf32> to vector<2x8x128xf32>
    %11 = vector.extract_strided_slice %8 {offsets = [0, 0, 0], sizes = [2, 5, 128], strides = [1, 1, 1]} : vector<2x8x128xf32> to vector<2x5x128xf32>
    %cst_8 = arith.constant dense<0.000000e+00> : vector<2x128xf32>
    %12 = vector.multi_reduction <add>, %11, %cst_8 [1] : vector<2x5x128xf32> to vector<2x128xf32>
    %13 = vector.extract_strided_slice %8 {offsets = [0, 3, 0], sizes = [2, 5, 128], strides = [1, 1, 1]} : vector<2x8x128xf32> to vector<2x5x128xf32>
    %cst_9 = arith.constant dense<0.000000e+00> : vector<2x128xf32>
    %14 = vector.multi_reduction <add>, %13, %cst_9 [1] : vector<2x5x128xf32> to vector<2x128xf32>
    %15 = vector.extract_strided_slice %10 {offsets = [0, 0, 0], sizes = [2, 5, 128], strides = [1, 1, 1]} : vector<2x8x128xf32> to vector<2x5x128xf32>
    %cst_10 = arith.constant dense<0.000000e+00> : vector<2x128xf32>
    %16 = vector.multi_reduction <add>, %15, %cst_10 [1] : vector<2x5x128xf32> to vector<2x128xf32>
    %17 = vector.extract_strided_slice %10 {offsets = [0, 3, 0], sizes = [2, 5, 128], strides = [1, 1, 1]} : vector<2x8x128xf32> to vector<2x5x128xf32>
    %cst_11 = arith.constant dense<0.000000e+00> : vector<2x128xf32>
    %18 = vector.multi_reduction <add>, %17, %cst_11 [1] : vector<2x5x128xf32> to vector<2x128xf32>
    %19 = tpu.concatenate %12, %14, %16, %18 in 1 : vector<2x128xf32>, vector<2x128xf32>, vector<2x128xf32>, vector<2x128xf32> -> vector<2x512xf32>
    %c0_12 = arith.constant 0 : index
    %c0_13 = arith.constant 0 : index
    %20 = vector.load %arg3[%c0_12, %c0_13] : memref<1x512xf32, #tpu.memory_space<vmem>>, vector<1x512xf32>
    %21 = vector.broadcast %20 : vector<1x512xf32> to vector<2x512xf32>
    %22 = arith.addf %19, %21 : vector<2x512xf32>
    %cst_14 = arith.constant 0.000000e+00 : f32
    %23 = vector.broadcast %cst_14 : f32 to vector<2x512xf32>
    %24 = arith.maximumf %22, %23 : vector<2x512xf32>
    %25 = arith.truncf %24 : vector<2x512xf32> to vector<2x512xbf16>
    %c0_15 = arith.constant 0 : index
    %c0_16 = arith.constant 0 : index
    %26 = vector.load %arg4[%c0_15, %c0_16] : memref<512x768xbf16, #tpu.memory_space<vmem>>, vector<512x768xbf16>
    %cst_17 = arith.constant dense<0.000000e+00> : vector<2x768xf32>
    %27 = tpu.matmul %25, %26, %cst_17 {dimension_numbers = #tpu.dot_dimension_numbers<[1], [0], [0], [1], [0, 0, 1, 1], [], []>} : vector<2x512xbf16>, vector<512x768xbf16>, vector<2x768xf32> -> vector<2x768xf32>
    %c0_18 = arith.constant 0 : index
    %c0_19 = arith.constant 0 : index
    %28 = vector.load %arg5[%c0_18, %c0_19] : memref<1x768xf32, #tpu.memory_space<vmem>>, vector<1x768xf32>
    %29 = vector.broadcast %28 : vector<1x768xf32> to vector<2x768xf32>
    %30 = arith.addf %27, %29 : vector<2x768xf32>
    %cst_20 = arith.constant 0.000000e+00 : f32
    %31 = vector.broadcast %cst_20 : f32 to vector<2x768xf32>
    %32 = arith.maximumf %30, %31 : vector<2x768xf32>
    %33 = arith.truncf %32 : vector<2x768xf32> to vector<2x768xbf16>
    %c0_21 = arith.constant 0 : index
    %c0_22 = arith.constant 0 : index
    %34 = vector.load %arg6[%c0_21, %c0_22] : memref<768x128xbf16, #tpu.memory_space<vmem>>, vector<768x128xbf16>
    %cst_23 = arith.constant dense<0.000000e+00> : vector<2x128xf32>
    %35 = tpu.matmul %33, %34, %cst_23 {dimension_numbers = #tpu.dot_dimension_numbers<[1], [0], [0], [1], [0, 0, 1, 1], [], []>} : vector<2x768xbf16>, vector<768x128xbf16>, vector<2x128xf32> -> vector<2x128xf32>
    %c0_24 = arith.constant 0 : index
    %c0_25 = arith.constant 0 : index
    %36 = vector.load %arg7[%c0_24, %c0_25] : memref<1x128xf32, #tpu.memory_space<vmem>>, vector<1x128xf32>
    %37 = vector.broadcast %36 : vector<1x128xf32> to vector<2x128xf32>
    %38 = arith.addf %35, %37 : vector<2x128xf32>
    %c0_26 = arith.constant 0 : index
    %c0_27 = arith.constant 0 : index
    %39 = vector.load %arg8[%c0_26, %c0_27] : memref<2x128xf32, #tpu.memory_space<vmem>>, vector<2x128xf32>
    tpu.vector_store %arg8[%c0_26, %c0_27], %38 {strides = array<i32>} : memref<2x128xf32, #tpu.memory_space<vmem>>, vector<2x128xf32>,
    return
  }
  func.func @transform_0(%arg0: i32) -> (i32, i32, i32, i32) {
    %c0_i32 = arith.constant 0 : i32
    %c0_i32_0 = arith.constant 0 : i32
    %c0_i32_1 = arith.constant 0 : i32
    %c0_i32_2 = arith.constant 0 : i32
    return %arg0, %c0_i32, %c0_i32_0, %c0_i32_1 : i32, i32, i32, i32
  }
  func.func @transform_1(%arg0: i32) -> (i32, i32) {
    %c0_i32 = arith.constant 0 : i32
    %c0_i32_0 = arith.constant 0 : i32
    %c0_i32_1 = arith.constant 0 : i32
    return %c0_i32, %c0_i32_0 : i32, i32
  }
  func.func @transform_2(%arg0: i32) -> (i32, i32) {
    %c0_i32 = arith.constant 0 : i32
    %c0_i32_0 = arith.constant 0 : i32
    %c0_i32_1 = arith.constant 0 : i32
    return %c0_i32, %c0_i32_0 : i32, i32
  }
  func.func @transform_3(%arg0: i32) -> (i32, i32) {
    %c0_i32 = arith.constant 0 : i32
    %c0_i32_0 = arith.constant 0 : i32
    %c0_i32_1 = arith.constant 0 : i32
    return %c0_i32, %c0_i32_0 : i32, i32
  }
  func.func @transform_4(%arg0: i32) -> (i32, i32) {
    %c0_i32 = arith.constant 0 : i32
    %c0_i32_0 = arith.constant 0 : i32
    %c0_i32_1 = arith.constant 0 : i32
    return %c0_i32, %c0_i32_0 : i32, i32
  }
  func.func @transform_5(%arg0: i32) -> (i32, i32) {
    %c0_i32 = arith.constant 0 : i32
    %c0_i32_0 = arith.constant 0 : i32
    %c0_i32_1 = arith.constant 0 : i32
    return %c0_i32, %c0_i32_0 : i32, i32
  }
  func.func @transform_6(%arg0: i32) -> (i32, i32) {
    %c0_i32 = arith.constant 0 : i32
    %c0_i32_0 = arith.constant 0 : i32
    %c0_i32_1 = arith.constant 0 : i32
    return %c0_i32, %c0_i32_0 : i32, i32
  }
  func.func @transform_7(%arg0: i32) -> (i32, i32) {
    %c0_i32 = arith.constant 0 : i32
    %c0_i32_0 = arith.constant 0 : i32
    return %arg0, %c0_i32 : i32, i32
  }
}

</mosaic_0001>

<bundles_post_ra>
// kernel: tile.8
= control target key start
LH: loop header
LB: loop body
LE: loop exit
PB: predicated region body
PF: predicated region fallthrough
CT: control target
= control target key end

     0   :  { %s22_s0 = inlined_call_operand.vmem [shape: f32[128], index: 0, kind: input, shape index: {}]   ;;  %s23_s1 = inlined_call_operand.vmem [shape: f32[4,128], index: 1, kind: output, shape index: {}]  }
   0x1   :  { %v4_v0 = vld [vmem:[%s22_s0] ss:$0 sm:$0xff] }
   0x2   :  { %5 = vst [vmem:[%s23_s1] sm:$0xf] %v4_v0 }

// kernel: aux_head_forward.1
= control target key start
LH: loop header
LB: loop body
LE: loop exit
PB: predicated region body
PF: predicated region fallthrough
CT: control target
= control target key end

     0   :  { %vm158_vm0 = vcmask 1041408   ;;  %s5058_s0 = inlined_call_operand.vmem [shape: bf16[2,8,8,4], index: 0, kind: input, shape index: {}]   ;;  %s5059_s1 = inlined_call_operand.vmem [shape: bf16[4,128], index: 1, kind: input, shape index: {}]   ;;  %s5060_s2 = inlined_call_operand.vmem [shape: f32[1,512], index: 2, kind: input, shape index: {}]   ;;  %s5061_s3 = inlined_call_operand.vmem [shape: bf16[512,768], index: 3, kind: input, shape index: {}]   ;;  %s5062_s4 = inlined_call_operand.vmem [shape: f32[1,768], index: 4, kind: input, shape index: {}]   ;;  %s5063_s5 = inlined_call_operand.vmem [shape: bf16[768,128], index: 5, kind: input, shape index: {}]   ;;  %s5064_s6 = inlined_call_operand.vmem [shape: f32[1,128], index: 6, kind: input, shape index: {}]   ;;  %s5065_s7 = inlined_call_operand.hbm [shape: f32[2,128], index: 7, kind: output, shape index: {}]  }
   0x1   :  { %v92_v0 = vld [vmem:[%s5059_s1] sm:$0x3] }
   0x2   :  { %v3517_v1 = vld [vmem:[%s5058_s0] sm:$0xff]   ;;  %v160_v2 = vsel %vm158_vm0, %v92_v0, 0 }
   0x3   :  { %v3518_v3 = vunpack.c.l.bf16 %v3517_v1  ;;  %v3519_v4 = vunpack.c.h.bf16 %v3517_v1 }
   0x4   :  { %12 = vsyncpa [#allocation3], 0  ;;  %169 = vmatpush.bf16.msra.mxu0 %v160_v2  ;;  %v3548_v7 = vld [vmem:[%s5058_s0 + $0x8] sm:$0xff]   ;;  %vm133_vm1 = vcmask 31744   ;;  %v3549_v21 = vld [vmem:[%s5058_s0 + $0x10] sm:$0xff]   ;;  %vm227_vm2 = vcmask 1044480  }
   0x5   :  { %v60_v5 = vmax.f32 %v3518_v3, 0.0  ;;  %v61_v6 = vmax.f32 %v3519_v4, 0.0  ;;  %v3522_v12 = vunpack.c.l.bf16 %v3548_v7  ;;  %v3523_v13 = vunpack.c.h.bf16 %v3548_v7  ;;  %v3550_v31 = vld [vmem:[%s5058_s0 + $0x18] sm:$0xff]   ;;  %v3551_v41 = vld [vmem:[%s5058_s0 + $0x20] sm:$0xff]   ;;  %v3552_v51 = vld [vmem:[%s5058_s0 + $0x28] sm:$0xff]   ;;  %s2299_s1 = sshll.u32 %s5065_s7, 4  ;;  %s2300_s1 = int_to_ptr.hbm [resolvable:$true] %s2299_s1 }
   0x6   :  { %v3526_v23 = vunpack.c.l.bf16 %v3549_v21  ;;  %v3527_v24 = vunpack.c.h.bf16 %v3549_v21  ;;  %v3530_v33 = vunpack.c.l.bf16 %v3550_v31  ;;  %v3531_v34 = vunpack.c.h.bf16 %v3550_v31  ;;  %v3553_v61 = vld [vmem:[%s5058_s0 + $0x30] sm:$0xff]   ;;  %v3554_v7 = vld [vmem:[%s5058_s0 + $0x38] sm:$0xff]  }
   0x7   :  { %v76_v8 = vpack.c.bf16 %v60_v5, %v60_v5  ;;  %v77_v9 = vpack.c.bf16 %v61_v6, %v61_v6  ;;  %v62_v15 = vmax.f32 %v3522_v12, 0.0  ;;  %v63_v16 = vmax.f32 %v3523_v13, 0.0  ;;  %v2678_v31 = vld [vmem:[%s5061_s3 + $0x2d0] sm:$0xf] }
   0x8   :  { %v64_v25 = vmax.f32 %v3526_v23, 0.0  ;;  %v65_v26 = vmax.f32 %v3527_v24, 0.0  ;;  %v66_v35 = vmax.f32 %v3530_v33, 0.0  ;;  %v67_v36 = vmax.f32 %v3531_v34, 0.0  ;;  %v2462_v34 = vld [vmem:[%s5061_s3 + $0x120] sm:$0xf] }
   0x9   :  { %v109_v10 = vunpack.c.l.b16 %v76_v8  ;;  %v110_v11 = vunpack.c.l.b16 %v77_v9  ;;  %v78_v17 = vpack.c.bf16 %v62_v15, %v62_v15  ;;  %v79_v18 = vpack.c.bf16 %v63_v16, %v63_v16 }
   0xa   :  { %v80_v27 = vpack.c.bf16 %v64_v25, %v64_v25  ;;  %v81_v28 = vpack.c.bf16 %v65_v26, %v65_v26  ;;  %v82_v37 = vpack.c.bf16 %v66_v35, %v66_v35  ;;  %v83_v38 = vpack.c.bf16 %v67_v36, %v67_v36  ;;  %v2486_v25 = vld [vmem:[%s5061_s3 + $0x150] sm:$0xf]  ;;  %v3321_v26 = vld [vmem:[%s5061_s3 + $0x164] sm:$0xf0]  ;;  %v3315_v35 = vld [vmem:[%s5061_s3 + $0x134] sm:$0xf0] }
   0xb   :  { %v125_v14 = vpack.c.b16 %v110_v11, %v109_v10  ;;  %v111_v19 = vunpack.c.l.b16 %v78_v17  ;;  %v112_v20 = vunpack.c.l.b16 %v79_v18  ;;  %v3534_v43 = vunpack.c.l.bf16 %v3551_v41 }
   0xc   :  { %v113_v29 = vunpack.c.l.b16 %v80_v27  ;;  %v114_v30 = vunpack.c.l.b16 %v81_v28  ;;  %v115_v39 = vunpack.c.l.b16 %v82_v37  ;;  %v116_v40 = vunpack.c.l.b16 %v83_v38  ;;  %v3319_v28 = vld [vmem:[%s5061_s3 + $0x15c] sm:$0xf]  ;;  %v3313_v37 = vld [vmem:[%s5061_s3 + $0x12c] sm:$0xf]  ;;  %v2472_v38 = vld [vmem:[%s5061_s3 + $0x140] sm:$0xf0] }
   0xd   :  { %2308 = vmatmul.msk.bf16.vlgmr.msra.gmra.mxu0 %vm133_vm1, %v125_v14  ;;  %v126_v22 = vpack.c.b16 %v112_v20, %v111_v19  ;;  %v3535_v44 = vunpack.c.h.bf16 %v3551_v41  ;;  %v68_v45 = vmax.f32 %v3534_v43, 0.0  ;;  %v3538_v53 = vunpack.c.l.bf16 %v3552_v51  ;;  %v2654_v41 = vld [vmem:[%s5061_s3 + $0x2a0] sm:$0xf] }
   0xe   :  { %v127_v32 = vpack.c.b16 %v114_v30, %v113_v29  ;;  %v128_v42 = vpack.c.b16 %v116_v40, %v115_v39  ;;  %v3539_v54 = vunpack.c.h.bf16 %v3552_v51  ;;  %v3542_v63 = vunpack.c.l.bf16 %v3553_v61  ;;  %v2496_v29 = vld [vmem:[%s5061_s3 + $0x170] sm:$0xf0] }
   0xf   :  { %v69_v46 = vmax.f32 %v3535_v44, 0.0  ;;  %v84_v47 = vpack.c.bf16 %v68_v45, %v68_v45  ;;  %v70_v55 = vmax.f32 %v3538_v53, 0.0  ;;  %v3543_v0 = vunpack.c.h.bf16 %v3553_v61  ;;  %v3357_v53 = vld [vmem:[%s5061_s3 + $0x284] sm:$0xf0] }
  0x10   :  { %v71_v56 = vmax.f32 %v3539_v54, 0.0  ;;  %v72_v1 = vmax.f32 %v3542_v63, 0.0  ;;  %v3546_v9 = vunpack.c.l.bf16 %v3554_v7  ;;  %v3547_v10 = vunpack.c.h.bf16 %v3554_v7  ;;  %v3351_v63 = vld [vmem:[%s5061_s3 + $0x254] sm:$0xf0]  ;;  %v2582_v7 = vld [vmem:[%s5061_s3 + $0x210] sm:$0xf] }
  0x11   :  { %v85_v48 = vpack.c.bf16 %v69_v46, %v69_v46  ;;  %v117_v49 = vunpack.c.l.b16 %v84_v47  ;;  %v86_v57 = vpack.c.bf16 %v70_v55, %v70_v55  ;;  %v73_v2 = vmax.f32 %v3543_v0, 0.0  ;;  %v2438_v46 = vld [vmem:[%s5061_s3 + $0xf0] sm:$0xf]  ;;  %v3309_v47 = vld [vmem:[%s5061_s3 + $0x104] sm:$0xf0] }
  0x12   :  { %v87_v58 = vpack.c.bf16 %v71_v56, %v71_v56  ;;  %v88_v3 = vpack.c.bf16 %v72_v1, %v72_v1  ;;  %v74_v11 = vmax.f32 %v3546_v9, 0.0  ;;  %v75_v12 = vmax.f32 %v3547_v10, 0.0  ;;  %v2414_v55 = vld [vmem:[%s5061_s3 + $0xc0] sm:$0xf]  ;;  %v3303_v56 = vld [vmem:[%s5061_s3 + $0xd4] sm:$0xf0] }
  0x13   :  { %v118_v50 = vunpack.c.l.b16 %v85_v48  ;;  %v119_v59 = vunpack.c.l.b16 %v86_v57  ;;  %v89_v4 = vpack.c.bf16 %v73_v2, %v73_v2  ;;  %v2487_v27 = vor.u32 %v3321_v26, %v2486_v25  ;;  %v2390_v2 = vld [vmem:[%s5061_s3 + $0x90] sm:$0xf]  ;;  %v3345_v9 = vld [vmem:[%s5061_s3 + $0x224] sm:$0xf0] }
  0x14   :  { %v120_v60 = vunpack.c.l.b16 %v87_v58  ;;  %v121_v5 = vunpack.c.l.b16 %v88_v3  ;;  %v90_v13 = vpack.c.bf16 %v74_v11, %v74_v11  ;;  %v91_v14 = vpack.c.bf16 %v75_v12, %v75_v12  ;;  %v3301_v58 = vld [vmem:[%s5061_s3 + $0xcc] sm:$0xf]  ;;  %v3297_v3 = vld [vmem:[%s5061_s3 + $0xa4] sm:$0xf0]  ;;  %v2366_v11 = vld [vmem:[%s5061_s3 + $0x60] sm:$0xf] }
  0x15   :  { %v129_v52 = vpack.c.b16 %v118_v50, %v117_v49  ;;  %v122_v6 = vunpack.c.l.b16 %v89_v4  ;;  %v2499_v30 = vor.u32 %v3319_v28, %v2496_v29  ;;  %1501 = vmatpush.bf16.msra.mxu1 %v2487_v27  ;;  %v2463_v36 = vor.u32 %v3315_v35, %v2462_v34  ;;  %v3307_v49 = vld [vmem:[%s5061_s3 + $0xfc] sm:$0xf]  ;;  %v2448_v50 = vld [vmem:[%s5061_s3 + $0x110] sm:$0xf0]  ;;  %v3291_v12 = vld [vmem:[%s5061_s3 + $0x74] sm:$0xf0] }
  0x16   :  { %v130_v62 = vpack.c.b16 %v120_v60, %v119_v59  ;;  %v123_v15 = vunpack.c.l.b16 %v90_v13  ;;  %v124_v16 = vunpack.c.l.b16 %v91_v14  ;;  %v2475_v40 = vor.u32 %v3313_v37, %v2472_v38  ;;  %v2424_v59 = vld [vmem:[%s5061_s3 + $0xe0] sm:$0xf0]  ;;  %v3295_v4 = vld [vmem:[%s5061_s3 + $0x9c] sm:$0xf]  ;;  %v3289_v14 = vld [vmem:[%s5061_s3 + $0x6c] sm:$0xf] }
  0x17   :  { %v131_v8 = vpack.c.b16 %v122_v6, %v121_v5  ;;  %1657 = vmatpush.bf16.msrb.mxu0 %v2499_v30  ;;  %v2439_v48 = vor.u32 %v3309_v47, %v2438_v46  ;;  %v2451_v51 = vor.u32 %v3307_v49, %v2448_v50  ;;  %v2415_v57 = vor.u32 %v3303_v56, %v2414_v55  ;;  %v2400_v6 = vld [vmem:[%s5061_s3 + $0xb0] sm:$0xf0]  ;;  %v3417_v26 = vld [vmem:[%s5061_s3 + $0x464] sm:$0xf0]  ;;  %v3283_v27 = vld [vmem:[%s5061_s3 + $0x3c] sm:$0xf] }
  0x18   :  { %v132_v17 = vpack.c.b16 %v124_v16, %v123_v15  ;;  %v2427_v61 = vor.u32 %v3301_v58, %v2424_v59  ;;  %v2391_v5 = vor.u32 %v3297_v3, %v2390_v2  ;;  %v2583_v10 = vor.u32 %v3345_v9, %v2582_v7  ;;  %v2376_v15 = vld [vmem:[%s5061_s3 + $0x80] sm:$0xf0]  ;;  %v2352_v28 = vld [vmem:[%s5061_s3 + $0x50] sm:$0xf0]  ;;  %v2318_v34 = vld [vmem:[%s5061_s3] sm:$0xf] }
  0x19   :  { %1502 = vmatpush.bf16.msra.mxu1 %v2463_v36  ;;  %v2367_v13 = vor.u32 %v3291_v12, %v2366_v11  ;;  %v2355_v30 = vor.u32 %v3283_v27, %v2352_v28  ;;  %v3279_v35 = vld [vmem:[%s5061_s3 + $0x14] sm:$0xf0]  ;;  %v2846_v36 = vld [vmem:[%s5061_s3 + $0x420] sm:$0xf]  ;;  %v2328_v46 = vld [vmem:[%s5061_s3 + $0x20] sm:$0xf0] }
  0x1a   :  { %v2319_v37 = vor.u32 %v3279_v35, %v2318_v34  ;;  %v3411_v38 = vld [vmem:[%s5061_s3 + $0x434] sm:$0xf0]  ;;  %v2510_v47 = vld [vmem:[%s5061_s3 + $0x180] sm:$0xf]  ;;  %v3318_v55 = vld [vmem:[%s5061_s3 + $0x154] sm:$0xf] }
  0x1b   :  { %1658 = vmatpush.bf16.msrb.mxu0 %v2475_v40  ;;  %v3465_v40 = vld [vmem:[%s5061_s3 + $0x5e4] sm:$0xf0]  ;;  %v3327_v50 = vld [vmem:[%s5061_s3 + $0x194] sm:$0xf0]  ;;  %v2488_v56 = vld [vmem:[%s5061_s3 + $0x168] sm:$0xf0] }
  0x1c   :  { %v2491_v58 = vor.u32 %v3318_v55, %v2488_v56  ;;  %v3405_v59 = vld [vmem:[%s5061_s3 + $0x404] sm:$0xf0]  ;;  %v3312_v2 = vld [vmem:[%s5061_s3 + $0x124] sm:$0xf]  ;;  %v3399_v7 = vld [vmem:[%s5061_s3 + $0x3d4] sm:$0xf0] }
  0x1d   :  { %2309 = vmatmul.msk.bf16.gmra.mxu0 %vm133_vm1, %v126_v22  ;;  %1503 = vmatpush.bf16.msra.mxu1 %v2439_v48  ;;  %v3453_v9 = vld [vmem:[%s5061_s3 + $0x584] sm:$0xf0]  ;;  %v3300_v28 = vld [vmem:[%s5061_s3 + $0xc4] sm:$0xf]  ;;  %v2966_v34 = vld [vmem:[%s5061_s3 + $0x510] sm:$0xf] }
  0x1e   :  { %v3441_v35 = vld [vmem:[%s5061_s3 + $0x524] sm:$0xf0]  ;;  %v3288_v55 = vld [vmem:[%s5061_s3 + $0x64] sm:$0xf]  ;;  %v2368_v56 = vld [vmem:[%s5061_s3 + $0x78] sm:$0xf0] }
  0x1f   :  { %1659 = vmatpush.bf16.msrb.mxu0 %v2451_v51  ;;  %v2502_v51 = vld [vmem:[%s5061_s3 + $0x160] sm:$0xf]  ;;  %vm298_vm3 = vcmask 1041409  }
  0x21   :  { %1504 = vmatpush.bf16.msra.mxu1 %v2415_v57  ;;  %v2822_v57 = vld [vmem:[%s5061_s3 + $0x3f0] sm:$0xf] }
  0x23   :  { %1660 = vmatpush.bf16.msrb.mxu0 %v2427_v61  ;;  %v2823_v61 = vor.u32 %v3405_v59, %v2822_v57  ;;  %v2371_v57 = vor.u32 %v3288_v55, %v2368_v56  ;;  %v3375_v59 = vld [vmem:[%s5061_s3 + $0x314] sm:$0xf0] }
  0x25   :  { %1505 = vmatpush.bf16.msra.mxu1 %v2391_v5  ;;  %v2798_v5 = vld [vmem:[%s5061_s3 + $0x3c0] sm:$0xf] }
  0x26   :  { %v2799_v11 = vor.u32 %v3399_v7, %v2798_v5  ;;  %v3287_v5 = vld [vmem:[%s5061_s3 + $0x54] sm:$0xf0] }
  0x29   :  { %1506 = vmatpush.bf16.msra.mxu1 %v2367_v13  ;;  %v2454_v13 = vld [vmem:[%s5061_s3 + $0x100] sm:$0xf] }
  0x2d   :  { %2310 = vmatmul.msk.bf16.gmra.mxu0 %vm133_vm1, %v127_v32  ;;  %v3369_v32 = vld [vmem:[%s5061_s3 + $0x2e4] sm:$0xf0] }
  0x2e   :  { %v2679_v33 = vor.u32 %v3369_v32, %v2678_v31  ;;  %v2534_v31 = vld [vmem:[%s5061_s3 + $0x1b0] sm:$0xf]  ;;  %v3333_v32 = vld [vmem:[%s5061_s3 + $0x1c4] sm:$0xf0] }
  0x30   :  { %1514 = vmatpush.bf16.msra.mxu2 %v2679_v33  ;;  %v2535_v33 = vor.u32 %v3333_v32, %v2534_v31  ;;  %v2750_v31 = vld [vmem:[%s5061_s3 + $0x360] sm:$0xf]  ;;  %v3387_v32 = vld [vmem:[%s5061_s3 + $0x374] sm:$0xf0] }
  0x3d   :  { %2311 = vmatmul.msk.bf16.gmra.mxu0 %vm133_vm1, %v128_v42  ;;  %v3363_v42 = vld [vmem:[%s5061_s3 + $0x2b4] sm:$0xf0] }
  0x3e   :  { %v2655_v45 = vor.u32 %v3363_v42, %v2654_v41  ;;  %v2847_v42 = vor.u32 %v3411_v38, %v2846_v36  ;;  %v2406_v38 = vld [vmem:[%s5061_s3 + $0xa0] sm:$0xf] }
  0x40   :  { %1515 = vmatpush.bf16.msra.mxu2 %v2655_v45  ;;  %v3277_v45 = vld [vmem:[%s5061_s3 + $0xc] sm:$0xf] }
  0x41   :  { %v2331_v49 = vor.u32 %v3277_v45, %v2328_v46  ;;  %v2726_v45 = vld [vmem:[%s5061_s3 + $0x330] sm:$0xf]  ;;  %v3381_v46 = vld [vmem:[%s5061_s3 + $0x344] sm:$0xf0] }
  0x4d   :  { %2312 = vmatmul.msk.bf16.gmra.mxu0 %vm133_vm1, %v129_v52  ;;  %v2630_v52 = vld [vmem:[%s5061_s3 + $0x270] sm:$0xf] }
  0x4e   :  { %v2631_v54 = vor.u32 %v3357_v53, %v2630_v52  ;;  %v3323_v52 = vld [vmem:[%s5061_s3 + $0x174] sm:$0xf0]  ;;  %v2511_v53 = vor.u32 %v3327_v50, %v2510_v47  ;;  %v2727_v47 = vor.u32 %v3381_v46, %v2726_v45 }
  0x4f   :  { %v3435_v50 = vld [vmem:[%s5061_s3 + $0x4f4] sm:$0xf0] }
  0x50   :  { %1516 = vmatpush.bf16.msra.mxu2 %v2631_v54  ;;  %v2503_v54 = vor.u32 %v3323_v52, %v2502_v51  ;;  %v2382_v52 = vld [vmem:[%s5061_s3 + $0x70] sm:$0xf] }
  0x5d   :  { %2313 = vmatmul.msk.bf16.gmra.mxu0 %vm133_vm1, %v130_v62  ;;  %v2606_v62 = vld [vmem:[%s5061_s3 + $0x240] sm:$0xf] }
  0x5e   :  { %v2607_v1 = vor.u32 %v3351_v63, %v2606_v62  ;;  %v3459_v62 = vld [vmem:[%s5061_s3 + $0x5b4] sm:$0xf0]  ;;  %v2478_v63 = vld [vmem:[%s5061_s3 + $0x130] sm:$0xf] }
  0x60   :  { %1517 = vmatpush.bf16.msra.mxu2 %v2607_v1  ;;  %v3317_v1 = vld [vmem:[%s5061_s3 + $0x144] sm:$0xf0] }
  0x61   :  { %v2479_v3 = vor.u32 %v3317_v1, %v2478_v63  ;;  %v3366_v1 = vld [vmem:[%s5061_s3 + $0x2d4] sm:$0xf] }
  0x64   :  { %1518 = vmatpush.bf16.msra.mxu2 %v2583_v10 }
  0x6d   :  { %2314 = vmatmul.msk.bf16.gmra.mxu0 %vm133_vm1, %v131_v8  ;;  %v2403_v8 = vor.u32 %v3295_v4, %v2400_v6  ;;  %v2464_v4 = vld [vmem:[%s5061_s3 + $0x138] sm:$0xf0] }
  0x6e   :  { %v2467_v6 = vor.u32 %v3312_v2, %v2464_v4  ;;  %v2680_v2 = vld [vmem:[%s5061_s3 + $0x2e8] sm:$0xf0] }
  0x6f   :  { %1661 = vmatpush.bf16.msrb.mxu0 %v2403_v8  ;;  %v3014_v8 = vld [vmem:[%s5061_s3 + $0x570] sm:$0xf]  ;;  %v2683_v4 = vor.u32 %v3366_v1, %v2680_v2 }
  0x70   :  { %v3015_v12 = vor.u32 %v3453_v9, %v3014_v8  ;;  %v2344_v8 = vld [vmem:[%s5061_s3 + $0x48] sm:$0xf0] }
  0x7d   :  { %2315 = vmatmul.msk.bf16.gmra.mxu0 %vm133_vm1, %v132_v17  ;;  %v2379_v17 = vor.u32 %v3289_v14, %v2376_v15  ;;  %v3311_v14 = vld [vmem:[%s5061_s3 + $0x114] sm:$0xf0] }
  0x7e   :  { %v2455_v15 = vor.u32 %v3311_v14, %v2454_v13  ;;  %v3360_v13 = vld [vmem:[%s5061_s3 + $0x2a4] sm:$0xf] }
  0x7f   :  { %1662 = vmatpush.bf16.msrb.mxu0 %v2379_v17  ;;  %v2440_v17 = vld [vmem:[%s5061_s3 + $0x108] sm:$0xf0] }
  0x83   :  { %1663 = vmatpush.bf16.msrb.mxu0 %v2355_v30 }
  0x87   :  { %1664 = vmatpush.bf16.msrb.mxu0 %v2331_v49  ;;  %v2942_v49 = vld [vmem:[%s5061_s3 + $0x4e0] sm:$0xf] }
  0x88   :  { %v2943_v51 = vor.u32 %v3435_v50, %v2942_v49  ;;  %v3336_v50 = vld [vmem:[%s5061_s3 + $0x1e4] sm:$0xf] }
  0x8a   :  { %v171_v18 = vpop.f32.mrf.mxu0 }
  0x8b   :  { %1709 = vmatpush.bf16.msra.mxu0 %v2503_v54 }
  0x8f   :  { %1710 = vmatpush.bf16.msra.mxu0 %v2479_v3  ;;  %v2358_v3 = vld [vmem:[%s5061_s3 + $0x40] sm:$0xf] }
  0x90   :  { %v2359_v7 = vor.u32 %v3287_v5, %v2358_v3  ;;  %v4059_v3 = vld [vmem:[%s5060_s2] sm:$0xf] }
  0x92   :  { %v173_v19 = vpop.f32.mrf.mxu0 }
  0x93   :  { %v211_v20 = vadd.f32 %v173_v19, %v171_v18  ;;  %v2558_v18 = vld [vmem:[%s5061_s3 + $0x1e0] sm:$0xf]  ;;  %v3339_v19 = vld [vmem:[%s5061_s3 + $0x1f4] sm:$0xf0]  ;;  %1711 = vmatpush.bf16.msra.mxu0 %v2455_v15  ;;  %v2656_v15 = vld [vmem:[%s5061_s3 + $0x2b8] sm:$0xf0] }
  0x9a   :  { %v176_v21 = vpop.f32.mrf.mxu0 }
  0x9b   :  { %v212_v22 = vadd.f32 %v211_v20, %v176_v21  ;;  %v2559_v21 = vor.u32 %v3339_v19, %v2558_v18  ;;  %v2774_v19 = vld [vmem:[%s5061_s3 + $0x390] sm:$0xf] }
  0x9d   :  { %1519 = vmatpush.bf16.msra.mxu2 %v2559_v21 }
  0xa1   :  { %1520 = vmatpush.bf16.msra.mxu2 %v2535_v33  ;;  %v2751_v33 = vor.u32 %v3387_v32, %v2750_v31  ;;  %v3348_v32 = vld [vmem:[%s5061_s3 + $0x244] sm:$0xf] }
  0xa2   :  { %v178_v23 = vpop.f32.mrf.mxu0 }
  0xa3   :  { %v213_v24 = vadd.f32 %v212_v22, %v178_v23  ;;  %v2342_v22 = vld [vmem:[%s5061_s3 + $0x30] sm:$0xf] }
  0xa5   :  { %1521 = vmatpush.bf16.msra.mxu2 %v2511_v53  ;;  %v3293_v53 = vld [vmem:[%s5061_s3 + $0x84] sm:$0xf0] }
  0xa6   :  { %v2383_v54 = vor.u32 %v3293_v53, %v2382_v52 }
  0xa9   :  { %1553 = vmatpush.bf16.msrb.mxu2 %v2491_v58  ;;  %v2702_v58 = vld [vmem:[%s5061_s3 + $0x300] sm:$0xf] }
  0xaa   :  { %v181_v39 = vpop.f32.mrf.mxu0 }
  0xab   :  { %v3695_v43 = vadd.f32 %v213_v24, %v181_v39  ;;  %v219_v44 = vadd.f32 %v181_v39, %v178_v23  ;;  %v3285_v23 = vld [vmem:[%s5061_s3 + $0x44] sm:$0xf0]  ;;  %v2870_v24 = vld [vmem:[%s5061_s3 + $0x450] sm:$0xf] }
  0xac   :  { %v2343_v25 = vor.u32 %v3285_v23, %v2342_v22  ;;  %v2871_v29 = vor.u32 %v3417_v26, %v2870_v24  ;;  %v3062_v39 = vld [vmem:[%s5061_s3 + $0x5d0] sm:$0xf]  ;;  %v2990_v22 = vld [vmem:[%s5061_s3 + $0x540] sm:$0xf]  ;;  %v3447_v23 = vld [vmem:[%s5061_s3 + $0x554] sm:$0xf0] }
  0xad   :  { %1554 = vmatpush.bf16.msrb.mxu2 %v2467_v6  ;;  %v2991_v24 = vor.u32 %v3447_v23, %v2990_v22  ;;  %v3305_v26 = vld [vmem:[%s5061_s3 + $0xe4] sm:$0xf0]  ;;  %v3282_v6 = vld [vmem:[%s5061_s3 + $0x34] sm:$0xf]  ;;  %v2320_v22 = vld [vmem:[%s5061_s3 + $0x18] sm:$0xf0] }
  0xae   :  { %1507 = vmatpush.bf16.msra.mxu1 %v2343_v25  ;;  %1527 = vmatpush.bf16.msra.mxu3 %v2871_v29  ;;  %v2430_v25 = vld [vmem:[%s5061_s3 + $0xd0] sm:$0xf]  ;;  %v2416_v29 = vld [vmem:[%s5061_s3 + $0xd8] sm:$0xf0]  ;;  %v2347_v9 = vor.u32 %v3282_v6, %v2344_v8  ;;  %v228_v23 = vsel %vm227_vm2, %v3695_v43, 0.0 }
  0xaf   :  { %v2431_v27 = vor.u32 %v3305_v26, %v2430_v25  ;;  %v2419_v30 = vor.u32 %v3300_v28, %v2416_v29  ;;  %v3354_v26 = vld [vmem:[%s5061_s3 + $0x274] sm:$0xf]  ;;  %v3324_v8 = vld [vmem:[%s5061_s3 + $0x184] sm:$0xf] }
  0xb1   :  { %1712 = vmatpush.bf16.msra.mxu0 %v2431_v27  ;;  %v2632_v27 = vld [vmem:[%s5061_s3 + $0x288] sm:$0xf0] }
  0xb2   :  { %v183_v60 = vpop.f32.mrf.mxu0  ;;  %1508 = vmatpush.bf16.msra.mxu1 %v2319_v37  ;;  %1528 = vmatpush.bf16.msra.mxu3 %v2847_v42  ;;  %v2967_v37 = vor.u32 %v3441_v35, %v2966_v34  ;;  %v2392_v42 = vld [vmem:[%s5061_s3 + $0xa8] sm:$0xf0]  ;;  %v2635_v29 = vor.u32 %v3354_v26, %v2632_v27  ;;  %v2504_v27 = vld [vmem:[%s5061_s3 + $0x178] sm:$0xf0] }
  0xb3   :  { %v220_v0 = vadd.f32 %v219_v44, %v183_v60  ;;  %v3063_v44 = vor.u32 %v3465_v40, %v3062_v39  ;;  %v3038_v60 = vld [vmem:[%s5061_s3 + $0x5a0] sm:$0xf]  ;;  %v3299_v39 = vld [vmem:[%s5061_s3 + $0xb4] sm:$0xf0]  ;;  %v2872_v26 = vld [vmem:[%s5061_s3 + $0x468] sm:$0xf0] }
  0xb4   :  { %v2407_v40 = vor.u32 %v3299_v39, %v2406_v38 }
  0xb6   :  { %1540 = vmatpush.bf16.msrb.mxu1 %v3063_v44  ;;  %1529 = vmatpush.bf16.msra.mxu3 %v2823_v61  ;;  %v2918_v61 = vld [vmem:[%s5061_s3 + $0x4b0] sm:$0xf] }
  0xb7   :  { %1713 = vmatpush.bf16.msra.mxu0 %v2407_v40 }
  0xba   :  { %v186_v16 = vpop.f32.mrf.mxu0  ;;  %1530 = vmatpush.bf16.msra.mxu3 %v2799_v11  ;;  %v2894_v11 = vld [vmem:[%s5061_s3 + $0x480] sm:$0xf] }
  0xbb   :  { %v221_v20 = vadd.f32 %v220_v0, %v186_v16  ;;  %v3039_v0 = vor.u32 %v3459_v62, %v3038_v60  ;;  %v3306_v16 = vld [vmem:[%s5061_s3 + $0xf4] sm:$0xf]  ;;  %v2703_v60 = vor.u32 %v3375_v59, %v2702_v58  ;;  %v3429_v62 = vld [vmem:[%s5061_s3 + $0x4c4] sm:$0xf0]  ;;  %1714 = vmatpush.bf16.msra.mxu0 %v2383_v54 }
  0xbc   :  { %v2443_v18 = vor.u32 %v3306_v16, %v2440_v17  ;;  %v244_v16 = vrot.slane %v3695_v43, 3  ;;  %v2659_v17 = vor.u32 %v3360_v13, %v2656_v15 }
  0xbd   :  { %1541 = vmatpush.bf16.msrb.mxu1 %v3039_v0  ;;  %v2919_v0 = vor.u32 %v3429_v62, %v2918_v61  ;;  %v3330_v61 = vld [vmem:[%s5061_s3 + $0x1b4] sm:$0xf]  ;;  %v2536_v62 = vld [vmem:[%s5061_s3 + $0x1c8] sm:$0xf0] }
  0xbe   :  { %1555 = vmatpush.bf16.msrb.mxu2 %v2443_v18  ;;  %v2334_v18 = vld [vmem:[%s5061_s3 + $0x10] sm:$0xf]  ;;  %v248_v28 = vsel %vm227_vm2, %v244_v16, 0.0 }
  0xbf   :  { %1715 = vmatpush.bf16.msra.mxu0 %v2359_v7  ;;  %v249_v31 = vrot.slane %v248_v28, 4 }
  0xc1   :  { %1542 = vmatpush.bf16.msrb.mxu1 %v3015_v12  ;;  %v3423_v12 = vld [vmem:[%s5061_s3 + $0x494] sm:$0xf0]  ;;  %v250_v39 = vadd.f32 %v249_v31, %v248_v28 }
  0xc2   :  { %v188_v41 = vpop.f32.mrf.mxu0  ;;  %1556 = vmatpush.bf16.msrb.mxu2 %v2419_v30  ;;  %v2895_v14 = vor.u32 %v3423_v12, %v2894_v11  ;;  %v229_v30 = vrot.slane %v228_v23, 4  ;;  %v315_v11 = vperm.slane %v4059_v3, 0 }
  0xc3   :  { %v3820_v48 = vadd.f32 %v221_v20, %v188_v41  ;;  %v3393_v20 = vld [vmem:[%s5061_s3 + $0x3a4] sm:$0xf0]  ;;  %v3294_v41 = vld [vmem:[%s5061_s3 + $0x94] sm:$0xf] }
  0xc4   :  { %v2775_v21 = vor.u32 %v3393_v20, %v2774_v19  ;;  %v2395_v44 = vor.u32 %v3294_v41, %v2392_v42  ;;  %v3281_v19 = vld [vmem:[%s5061_s3 + $0x24] sm:$0xf0] }
  0xc5   :  { %1543 = vmatpush.bf16.msrb.mxu1 %v2991_v24  ;;  %v2335_v20 = vor.u32 %v3281_v19, %v2334_v18  ;;  %v262_v16 = vsel %vm227_vm2, %v3820_v48, 0.0  ;;  %v316_v18 = vperm.slane %v4059_v3, 1 }
  0xc6   :  { %1531 = vmatpush.bf16.msra.mxu3 %v2775_v21  ;;  %1557 = vmatpush.bf16.msrb.mxu2 %v2395_v44  ;;  %v3276_v21 = vld [vmem:[%s5061_s3 + $0x4] sm:$0xf]  ;;  %v263_v28 = vrot.slane %v262_v16, 4 }
  0xc7   :  { %v2323_v24 = vor.u32 %v3276_v21, %v2320_v22  ;;  %1716 = vmatpush.bf16.msra.mxu0 %v2335_v20 }
  0xc9   :  { %1544 = vmatpush.bf16.msrb.mxu1 %v2967_v37  ;;  %v230_v37 = vadd.f32 %v229_v30, %v228_v23  ;;  %v3414_v23 = vld [vmem:[%s5061_s3 + $0x454] sm:$0xf] }
  0xca   :  { %v3873_v10 = vpop.f32.mrf.mxu0  ;;  %1532 = vmatpush.bf16.msra.mxu3 %v2751_v33  ;;  %1558 = vmatpush.bf16.msrb.mxu2 %v2371_v57  ;;  %v2608_v33 = vld [vmem:[%s5061_s3 + $0x258] sm:$0xf0] }
  0xcb   :  { %v2611_v35 = vor.u32 %v3348_v32, %v2608_v33  ;;  %v231_v44 = vrot.slane %v230_v37, 2  ;;  %v3462_v33 = vld [vmem:[%s5061_s3 + $0x5d4] sm:$0xf] }
  0xcd   :  { %1545 = vmatpush.bf16.msrb.mxu1 %v2943_v51  ;;  %v2560_v51 = vld [vmem:[%s5061_s3 + $0x1f8] sm:$0xf0]  ;;  %v232_v54 = vadd.f32 %v231_v44, %v230_v37 }
  0xce   :  { %1533 = vmatpush.bf16.msra.mxu3 %v2727_v47  ;;  %1559 = vmatpush.bf16.msrb.mxu2 %v2347_v9  ;;  %v251_v47 = vrot.slane %v250_v39, 2  ;;  %v2563_v53 = vor.u32 %v3336_v50, %v2560_v51  ;;  %v2512_v9 = vld [vmem:[%s5061_s3 + $0x198] sm:$0xf0] }
  0xcf   :  { %v2515_v12 = vor.u32 %v3324_v8, %v2512_v9  ;;  %v3040_v50 = vld [vmem:[%s5061_s3 + $0x5b8] sm:$0xf0]  ;;  %v3302_v9 = vld [vmem:[%s5061_s3 + $0xd4] sm:$0xf] }
  0xd0   :  { %v252_v57 = vadd.f32 %v251_v47, %v250_v39 }
  0xd1   :  { %1546 = vmatpush.bf16.msrb.mxu1 %v2919_v0  ;;  %v233_v0 = vrot.slane %v232_v54, 1 }
  0xd2   :  { %v3923_v36 = vpop.f32.mrf.mxu0  ;;  %1534 = vmatpush.bf16.msra.mxu3 %v2703_v60  ;;  %1560 = vmatpush.bf16.msrb.mxu2 %v2323_v24  ;;  %v253_v5 = vrot.slane %v252_v57, 1 }
  0xd3   :  { %v215_v43 = vadd.f32 %v3923_v36, %v3873_v10  ;;  %v3342_v10 = vld [vmem:[%s5061_s3 + $0x214] sm:$0xf]  ;;  %v2584_v36 = vld [vmem:[%s5061_s3 + $0x228] sm:$0xf0]  ;;  %v234_v13 = vadd.f32 %v233_v0, %v232_v54 }
  0xd4   :  { %v2587_v42 = vor.u32 %v3342_v10, %v2584_v36  ;;  %v254_v19 = vadd.f32 %v253_v5, %v252_v57  ;;  %v3314_v36 = vld [vmem:[%s5061_s3 + $0x134] sm:$0xf]  ;;  %v3308_v57 = vld [vmem:[%s5061_s3 + $0x104] sm:$0xf] }
  0xd5   :  { %1547 = vmatpush.bf16.msrb.mxu1 %v2895_v14  ;;  %v3402_v54 = vld [vmem:[%s5061_s3 + $0x3f4] sm:$0xf] }
  0xd6   :  { %1566 = vmatpush.bf16.msrb.mxu3 %v2683_v4  ;;  %v278_v4 = vrot.slane %v3820_v48, 3  ;;  %v3320_v48 = vld [vmem:[%s5061_s3 + $0x164] sm:$0xf]  ;;  %v3450_v0 = vld [vmem:[%s5061_s3 + $0x574] sm:$0xf] }
  0xd7   :  { %v2507_v37 = vor.u32 %v3320_v48, %v2504_v27  ;;  %v2408_v48 = vld [vmem:[%s5061_s3 + $0xb8] sm:$0xf0] }
  0xda   :  { %v196_v63 = vpop.f32.mrf.mxu0  ;;  %1567 = vmatpush.bf16.msrb.mxu3 %v2659_v17  ;;  %v282_v17 = vsel %vm227_vm2, %v278_v4, 0.0 }
  0xdb   :  { %v216_v34 = vadd.f32 %v215_v43, %v196_v63  ;;  %v2539_v63 = vor.u32 %v3330_v61, %v2536_v62 }
  0xde   :  { %1568 = vmatpush.bf16.msrb.mxu3 %v2635_v29  ;;  %v283_v29 = vrot.slane %v282_v17, 4 }
  0xe0   :  { %v284_v44 = vadd.f32 %v283_v29, %v282_v17  ;;  %v3444_v17 = vld [vmem:[%s5061_s3 + $0x544] sm:$0xf] }
  0xe2   :  { %v4018_v25 = vpop.f32.mrf.mxu0  ;;  %1569 = vmatpush.bf16.msrb.mxu3 %v2611_v35  ;;  %v2875_v35 = vor.u32 %v3414_v23, %v2872_v26  ;;  %v3390_v23 = vld [vmem:[%s5061_s3 + $0x394] sm:$0xf]  ;;  %v3296_v26 = vld [vmem:[%s5061_s3 + $0xa4] sm:$0xf] }
  0xe3   :  { %v217_v38 = vadd.f32 %v216_v34, %v4018_v25  ;;  %v3064_v34 = vld [vmem:[%s5061_s3 + $0x5e8] sm:$0xf0] }
  0xe6   :  { %1570 = vmatpush.bf16.msrb.mxu3 %v2587_v42  ;;  %v264_v42 = vadd.f32 %v263_v28, %v262_v16 }
  0xea   :  { %v201_v40 = vpop.f32.mrf.mxu0  ;;  %1571 = vmatpush.bf16.msrb.mxu3 %v2563_v53 }
  0xeb   :  { %v218_v41 = vadd.f32 %v217_v38, %v201_v40  ;;  %v223_v43 = vadd.f32 %v201_v40, %v4018_v25  ;;  %v3408_v38 = vld [vmem:[%s5061_s3 + $0x424] sm:$0xf]  ;;  %v2848_v25 = vld [vmem:[%s5061_s3 + $0x438] sm:$0xf0] }
  0xed   :  { %v235_v45 = vsel %vm227_vm2, %v218_v41, 0.0  ;;  %v245_v46 = vrot.slane %v218_v41, 3  ;;  %v2480_v41 = vld [vmem:[%s5061_s3 + $0x148] sm:$0xf0] }
  0xee   :  { %v236_v49 = vrot.slane %v235_v45, 4  ;;  %1572 = vmatpush.bf16.msrb.mxu3 %v2539_v63  ;;  %v2483_v53 = vor.u32 %v3314_v36, %v2480_v41  ;;  %v2384_v36 = vld [vmem:[%s5061_s3 + $0x88] sm:$0xf0] }
  0xef   :  { %v255_v52 = vsel %vm227_vm2, %v245_v46, 0.0 }
  0xf0   :  { %v237_v55 = vadd.f32 %v236_v49, %v235_v45  ;;  %v256_v56 = vrot.slane %v255_v52, 4  ;;  %v3067_v45 = vor.u32 %v3462_v33, %v3064_v34  ;;  %v3456_v49 = vld [vmem:[%s5061_s3 + $0x5a4] sm:$0xf] }
  0xf1   :  { %v3043_v61 = vor.u32 %v3456_v49, %v3040_v50  ;;  %v318_v49 = vperm.slane %v4059_v3, 3 }
  0xf2   :  { %v238_v58 = vrot.slane %v237_v55, 2  ;;  %v257_v59 = vadd.f32 %v256_v56, %v255_v52  ;;  %v203_v60 = vpop.f32.mrf.mxu0  ;;  %1573 = vmatpush.bf16.msrb.mxu3 %v2515_v12  ;;  %v2851_v52 = vor.u32 %v3408_v38, %v2848_v25  ;;  %v2824_v56 = vld [vmem:[%s5061_s3 + $0x408] sm:$0xf0]  ;;  %v3384_v38 = vld [vmem:[%s5061_s3 + $0x364] sm:$0xf] }
  0xf3   :  { %v224_v10 = vadd.f32 %v223_v43, %v203_v60  ;;  %v285_v60 = vrot.slane %v284_v44, 2  ;;  %v2827_v4 = vor.u32 %v3402_v54, %v2824_v56  ;;  %v2752_v25 = vld [vmem:[%s5061_s3 + $0x378] sm:$0xf0] }
  0xf4   :  { %v239_v1 = vadd.f32 %v238_v58, %v237_v55  ;;  %v258_v2 = vrot.slane %v257_v59, 2  ;;  %v2456_v58 = vld [vmem:[%s5061_s3 + $0x118] sm:$0xf0]  ;;  %v2755_v50 = vor.u32 %v3384_v38, %v2752_v25  ;;  %v2422_v25 = vld [vmem:[%s5061_s3 + $0xc8] sm:$0xf] }
  0xf5   :  { %v2459_v5 = vor.u32 %v3308_v57, %v2456_v58  ;;  %v286_v16 = vadd.f32 %v285_v60, %v284_v44  ;;  %v2728_v57 = vld [vmem:[%s5061_s3 + $0x348] sm:$0xf0]  ;;  %v2494_v58 = vld [vmem:[%s5061_s3 + $0x158] sm:$0xf] }
  0xf6   :  { %v240_v6 = vrot.slane %v239_v1, 1  ;;  %v259_v7 = vadd.f32 %v258_v2, %v257_v59  ;;  %v265_v59 = vrot.slane %v264_v42, 2 }
  0xf7   :  { %v287_v43 = vrot.slane %v286_v16, 1 }
  0xf8   :  { %v241_v14 = vadd.f32 %v240_v6, %v239_v1  ;;  %v260_v15 = vrot.slane %v259_v7, 1  ;;  %v3016_v1 = vld [vmem:[%s5061_s3 + $0x588] sm:$0xf0]  ;;  %v3396_v6 = vld [vmem:[%s5061_s3 + $0x3c4] sm:$0xf]  ;;  %v266_v12 = vadd.f32 %v265_v59, %v264_v42 }
  0xf9   :  { %v3322_v59 = vld [vmem:[%s5061_s3 + $0x16c] sm:$0xf0] }
  0xfa   :  { %v261_v20 = vadd.f32 %v260_v15, %v259_v7  ;;  %v299_v21 = vsel %vm298_vm3, %v241_v14, %v234_v13  ;;  %v206_v22 = vpop.f32.mrf.mxu0  ;;  %v2800_v7 = vld [vmem:[%s5061_s3 + $0x3d8] sm:$0xf0]  ;;  %v3019_v15 = vor.u32 %v3450_v0, %v3016_v1  ;;  %v267_v27 = vrot.slane %v266_v12, 1 }
  0xfb   :  { %v323_v24 = vadd.f32 %v315_v11, %v299_v21  ;;  %v225_v47 = vadd.f32 %v224_v10, %v206_v22  ;;  %v2432_v11 = vld [vmem:[%s5061_s3 + $0xe8] sm:$0xf0]  ;;  %v2803_v21 = vor.u32 %v3396_v6, %v2800_v7  ;;  %v3290_v10 = vld [vmem:[%s5061_s3 + $0x74] sm:$0xf]  ;;  %v2495_v6 = vor.u32 %v3322_v59, %v2494_v58  ;;  %v3372_v7 = vld [vmem:[%s5061_s3 + $0x304] sm:$0xf] }
  0xfc   :  { %v303_v30 = vsel %vm298_vm3, %v261_v20, %v254_v19  ;;  %v2435_v22 = vor.u32 %v3302_v9, %v2432_v11  ;;  %v268_v41 = vadd.f32 %v267_v27, %v266_v12  ;;  %v2470_v9 = vld [vmem:[%s5061_s3 + $0x128] sm:$0xf]  ;;  %v3292_v58 = vld [vmem:[%s5061_s3 + $0x7c] sm:$0xf0]  ;;  %v2590_v59 = vld [vmem:[%s5061_s3 + $0x218] sm:$0xf] }
  0xfd   :  { %v324_v31 = vadd.f32 %v316_v18, %v303_v30  ;;  %v327_v32 = vmax.f32 %v323_v24, 0.0  ;;  %v2992_v18 = vld [vmem:[%s5061_s3 + $0x558] sm:$0xf0]  ;;  %v2776_v24 = vld [vmem:[%s5061_s3 + $0x3a8] sm:$0xf0] }
  0xfe   :  { %v2995_v30 = vor.u32 %v3444_v17, %v2992_v18  ;;  %v3370_v17 = vld [vmem:[%s5061_s3 + $0x2ec] sm:$0xf0]  ;;  %v3278_v18 = vld [vmem:[%s5061_s3 + $0x14] sm:$0xf] }
  0xff   :  { %v328_v39 = vmax.f32 %v324_v31, 0.0  ;;  %v4100_v40 = vpack.c.bf16 %v327_v32, %v327_v32  ;;  %v3438_v31 = vld [vmem:[%s5061_s3 + $0x514] sm:$0xf]  ;;  %v2968_v32 = vld [vmem:[%s5061_s3 + $0x528] sm:$0xf0] }
 0x101   :  { %v4108_v46 = vpack.c.bf16 %v328_v39, %v328_v39  ;;  %1509 = vmatmul.bf16.vlgmr.msra.gmra.mxu1 %v4100_v40  ;;  %1665 = vmatmul.bf16.vlgmr.msrb.gmra.mxu0 %v4100_v40  ;;  %v317_v39 = vperm.slane %v4059_v3, 2  ;;  %v3378_v3 = vld [vmem:[%s5061_s3 + $0x334] sm:$0xf] }
 0x102   :  { %1579 = vmatpush.bf16.msra.mxu1 %v2875_v35  ;;  %v208_v51 = vpop.f32.mrf.mxu0  ;;  %1761 = vmatpush.bf16.msrb.mxu0 %v2507_v37  ;;  %v2779_v35 = vor.u32 %v3390_v23, %v2776_v24  ;;  %v2411_v37 = vor.u32 %v3296_v26, %v2408_v48  ;;  %v2878_v26 = vld [vmem:[%s5061_s3 + $0x458] sm:$0xf]  ;;  %v3418_v48 = vld [vmem:[%s5061_s3 + $0x46c] sm:$0xf0] }
 0x103   :  { %v226_v55 = vadd.f32 %v225_v47, %v208_v51  ;;  %1522 = vmatmul.bf16.vlgmr.msra.gmra.mxu2 %v4108_v46  ;;  %v288_v47 = vadd.f32 %v287_v43, %v286_v16  ;;  %v3432_v51 = vld [vmem:[%s5061_s3 + $0x4e4] sm:$0xf] }
 0x104   :  { %1592 = vmatpush.bf16.msra.mxu2 %v3067_v45  ;;  %v2971_v45 = vor.u32 %v3438_v31, %v2968_v32  ;;  %v2662_v31 = vld [vmem:[%s5061_s3 + $0x2a8] sm:$0xf]  ;;  %v3364_v32 = vld [vmem:[%s5061_s3 + $0x2bc] sm:$0xf0] }
 0x105   :  { %v269_v62 = vsel %vm227_vm2, %v226_v55, 0.0  ;;  %v279_v63 = vrot.slane %v226_v55, 3  ;;  %v2387_v55 = vor.u32 %v3290_v10, %v2384_v36  ;;  %v2663_v38 = vor.u32 %v3364_v32, %v2662_v31  ;;  %v2638_v10 = vld [vmem:[%s5061_s3 + $0x278] sm:$0xf]  ;;  %v3358_v36 = vld [vmem:[%s5061_s3 + $0x28c] sm:$0xf0] }
 0x106   :  { %v270_v2 = vrot.slane %v269_v62, 4  ;;  %1580 = vmatpush.bf16.msra.mxu1 %v2851_v52  ;;  %1762 = vmatpush.bf16.msrb.mxu0 %v2483_v53  ;;  %v2944_v52 = vld [vmem:[%s5061_s3 + $0x4f8] sm:$0xf0]  ;;  %v2688_v32 = vld [vmem:[%s5061_s3 + $0x2f0] sm:$0xf0] }
 0x107   :  { %v289_v8 = vsel %vm227_vm2, %v279_v63, 0.0  ;;  %v2360_v63 = vld [vmem:[%s5061_s3 + $0x58] sm:$0xf0] }
 0x108   :  { %v271_v13 = vadd.f32 %v270_v2, %v269_v62  ;;  %v290_v14 = vrot.slane %v289_v8, 4  ;;  %1593 = vmatpush.bf16.msra.mxu2 %v3043_v61  ;;  %v2947_v61 = vor.u32 %v3432_v51, %v2944_v52  ;;  %v3284_v62 = vld [vmem:[%s5061_s3 + $0x44] sm:$0xf]  ;;  %v3426_v2 = vld [vmem:[%s5061_s3 + $0x4b4] sm:$0xf] }
 0x109   :  { %v2614_v51 = vld [vmem:[%s5061_s3 + $0x248] sm:$0xf]  ;;  %v3352_v52 = vld [vmem:[%s5061_s3 + $0x25c] sm:$0xf0]  ;;  %v3367_v31 = vld [vmem:[%s5061_s3 + $0x2dc] sm:$0xf] }
 0x10a   :  { %v272_v19 = vrot.slane %v271_v13, 2  ;;  %v291_v20 = vadd.f32 %v290_v14, %v289_v8  ;;  %1581 = vmatpush.bf16.msra.mxu1 %v2827_v4  ;;  %1763 = vmatpush.bf16.msrb.mxu0 %v2459_v5  ;;  %v2920_v4 = vld [vmem:[%s5061_s3 + $0x4c8] sm:$0xf0]  ;;  %v2731_v5 = vor.u32 %v3378_v3, %v2728_v57  ;;  %v2704_v8 = vld [vmem:[%s5061_s3 + $0x318] sm:$0xf0] }
 0x10b   :  { %v3316_v14 = vld [vmem:[%s5061_s3 + $0x13c] sm:$0xf0]  ;;  %v2923_v16 = vor.u32 %v3426_v2, %v2920_v4  ;;  %v2707_v23 = vor.u32 %v3372_v7, %v2704_v8  ;;  %v2374_v57 = vld [vmem:[%s5061_s3 + $0x68] sm:$0xf]  ;;  %v2350_v2 = vld [vmem:[%s5061_s3 + $0x38] sm:$0xf] }
 0x10c   :  { %v273_v28 = vadd.f32 %v272_v19, %v271_v13  ;;  %v292_v29 = vrot.slane %v291_v20, 2  ;;  %1594 = vmatpush.bf16.msra.mxu2 %v3019_v15  ;;  %v2363_v13 = vor.u32 %v3284_v62, %v2360_v63  ;;  %v2686_v15 = vld [vmem:[%s5061_s3 + $0x2d8] sm:$0xf]  ;;  %v2336_v19 = vld [vmem:[%s5061_s3 + $0x28] sm:$0xf0]  ;;  %v2471_v24 = vor.u32 %v3316_v14, %v2470_v9 }
 0x10d   :  { %v2687_v27 = vor.u32 %v3370_v17, %v2686_v15  ;;  %v3400_v3 = vld [vmem:[%s5061_s3 + $0x3dc] sm:$0xf0]  ;;  %v2375_v62 = vor.u32 %v3292_v58, %v2374_v57  ;;  %v2782_v63 = vld [vmem:[%s5061_s3 + $0x398] sm:$0xf]  ;;  %v3286_v4 = vld [vmem:[%s5061_s3 + $0x4c] sm:$0xf0] }
 0x10e   :  { %v274_v33 = vrot.slane %v273_v28, 1  ;;  %v293_v34 = vadd.f32 %v292_v29, %v291_v20  ;;  %1582 = vmatpush.bf16.msra.mxu1 %v2803_v21  ;;  %1764 = vmatpush.bf16.msrb.mxu0 %v2435_v22  ;;  %v3420_v21 = vld [vmem:[%s5061_s3 + $0x484] sm:$0xf]  ;;  %v2896_v22 = vld [vmem:[%s5061_s3 + $0x498] sm:$0xf0]  ;;  %v2351_v8 = vor.u32 %v3286_v4, %v2350_v2 }
 0x10f   :  { %v2446_v29 = vld [vmem:[%s5061_s3 + $0xf8] sm:$0xf]  ;;  %v2899_v43 = vor.u32 %v3420_v21, %v2896_v22  ;;  %v2758_v9 = vld [vmem:[%s5061_s3 + $0x368] sm:$0xf]  ;;  %v3280_v15 = vld [vmem:[%s5061_s3 + $0x1c] sm:$0xf0] }
 0x110   :  { %v275_v42 = vadd.f32 %v274_v33, %v273_v28  ;;  %v294_v44 = vrot.slane %v293_v34, 1  ;;  %1595 = vmatpush.bf16.msra.mxu2 %v2995_v30  ;;  %v2339_v28 = vor.u32 %v3278_v18, %v2336_v19  ;;  %v3310_v30 = vld [vmem:[%s5061_s3 + $0x10c] sm:$0xf0]  ;;  %v2879_v33 = vor.u32 %v3418_v48, %v2878_v26  ;;  %v2326_v14 = vld [vmem:[%s5061_s3 + $0x8] sm:$0xf] }
 0x111   :  { %1717 = vmatmul.bf16.vlgmr.msra.gmra.mxu0 %v4100_v40  ;;  %v3334_v17 = vld [vmem:[%s5061_s3 + $0x1cc] sm:$0xf0]  ;;  %v3070_v18 = vld [vmem:[%s5061_s3 + $0x5d8] sm:$0xf]  ;;  %v2327_v22 = vor.u32 %v3280_v15, %v2326_v14  ;;  %v2832_v57 = vld [vmem:[%s5061_s3 + $0x410] sm:$0xf0] }
 0x112   :  { %v295_v53 = vadd.f32 %v294_v44, %v293_v34  ;;  %v307_v54 = vsel %vm298_vm3, %v275_v42, %v268_v41  ;;  %1583 = vmatpush.bf16.msra.mxu1 %v2779_v35  ;;  %1765 = vmatpush.bf16.msrb.mxu0 %v2411_v37  ;;  %v2447_v34 = vor.u32 %v3310_v30, %v2446_v29  ;;  %v2854_v35 = vld [vmem:[%s5061_s3 + $0x428] sm:$0xf]  ;;  %v3412_v37 = vld [vmem:[%s5061_s3 + $0x43c] sm:$0xf0]  ;;  %v2830_v44 = vld [vmem:[%s5061_s3 + $0x3f8] sm:$0xf] }
 0x113   :  { %v325_v56 = vadd.f32 %v317_v39, %v307_v54  ;;  %1561 = vmatmul.bf16.vlgmr.msrb.gmra.mxu2 %v4100_v40  ;;  %v3304_v39 = vld [vmem:[%s5061_s3 + $0xdc] sm:$0xf0]  ;;  %v2855_v41 = vor.u32 %v3412_v37, %v2854_v35  ;;  %v3466_v19 = vld [vmem:[%s5061_s3 + $0x5ec] sm:$0xf0]  ;;  %v3046_v29 = vld [vmem:[%s5061_s3 + $0x5a8] sm:$0xf] }
 0x114   :  { %v311_v60 = vsel %vm298_vm3, %v295_v53, %v288_v47  ;;  %1596 = vmatpush.bf16.msra.mxu2 %v2971_v45  ;;  %v2423_v42 = vor.u32 %v3304_v39, %v2422_v25  ;;  %v3406_v45 = vld [vmem:[%s5061_s3 + $0x40c] sm:$0xf0]  ;;  %v2639_v47 = vor.u32 %v3358_v36, %v2638_v10  ;;  %v3071_v48 = vor.u32 %v3466_v19, %v3070_v18  ;;  %v3460_v30 = vld [vmem:[%s5061_s3 + $0x5bc] sm:$0xf0]  ;;  %v2880_v25 = vld [vmem:[%s5061_s3 + $0x470] sm:$0xf0] }
 0x115   :  { %v326_v0 = vadd.f32 %v318_v49, %v311_v60  ;;  %v329_v1 = vmax.f32 %v325_v56, 0.0  ;;  %v2398_v49 = vld [vmem:[%s5061_s3 + $0x98] sm:$0xf]  ;;  %v2831_v53 = vor.u32 %v3406_v45, %v2830_v44  ;;  %v2615_v56 = vor.u32 %v3352_v52, %v2614_v51  ;;  %v3346_v60 = vld [vmem:[%s5061_s3 + $0x22c] sm:$0xf0] }
 0x116   :  { %1584 = vmatpush.bf16.msra.mxu1 %v2755_v50  ;;  %1766 = vmatpush.bf16.msrb.mxu0 %v2387_v55  ;;  %v3298_v50 = vld [vmem:[%s5061_s3 + $0xac] sm:$0xf0]  ;;  %v2806_v55 = vld [vmem:[%s5061_s3 + $0x3c8] sm:$0xf]  ;;  %v3047_v37 = vor.u32 %v3460_v30, %v3046_v29  ;;  %v2691_v39 = vor.u32 %v3367_v31, %v2688_v32  ;;  %v3022_v10 = vld [vmem:[%s5061_s3 + $0x578] sm:$0xf] }
 0x117   :  { %v330_v11 = vmax.f32 %v326_v0, 0.0  ;;  %v4232_v12 = vpack.c.bf16 %v329_v1, %v329_v1  ;;  %v2399_v54 = vor.u32 %v3298_v50, %v2398_v49  ;;  %v3394_v0 = vld [vmem:[%s5061_s3 + $0x3ac] sm:$0xf0]  ;;  %v2591_v1 = vor.u32 %v3346_v60, %v2590_v59  ;;  %v2664_v44 = vld [vmem:[%s5061_s3 + $0x2c0] sm:$0xf0] }
 0x118   :  { %1597 = vmatpush.bf16.msra.mxu2 %v2947_v61  ;;  %v2807_v61 = vor.u32 %v3400_v3, %v2806_v55  ;;  %v2783_v7 = vor.u32 %v3394_v0, %v2782_v63  ;;  %v3454_v36 = vld [vmem:[%s5061_s3 + $0x58c] sm:$0xf0]  ;;  %v3409_v49 = vld [vmem:[%s5061_s3 + $0x42c] sm:$0xf]  ;;  %v2998_v51 = vld [vmem:[%s5061_s3 + $0x548] sm:$0xf] }
 0x119   :  { %v4249_v20 = vpack.c.bf16 %v330_v11, %v330_v11  ;;  %1535 = vmatmul.bf16.vlgmr.msra.gmra.mxu3 %v4232_v12  ;;  %v3388_v11 = vld [vmem:[%s5061_s3 + $0x37c] sm:$0xf0]  ;;  %v2974_v59 = vld [vmem:[%s5061_s3 + $0x518] sm:$0xf]  ;;  %v3442_v60 = vld [vmem:[%s5061_s3 + $0x52c] sm:$0xf0] }
 0x11a   :  { %1585 = vmatpush.bf16.msra.mxu1 %v2731_v5  ;;  %1605 = vmatpush.bf16.msra.mxu3 %v2495_v6  ;;  %v2566_v5 = vld [vmem:[%s5061_s3 + $0x1e8] sm:$0xf]  ;;  %v3340_v6 = vld [vmem:[%s5061_s3 + $0x1fc] sm:$0xf0]  ;;  %v2759_v21 = vor.u32 %v3388_v11, %v2758_v9  ;;  %v2975_v0 = vor.u32 %v3442_v60, %v2974_v59  ;;  %v2808_v2 = vld [vmem:[%s5061_s3 + $0x3e0] sm:$0xf0] }
 0x11b   :  { %1767 = vmatpush.bf16.msrb.mxu0 %v2363_v13  ;;  %1548 = vmatmul.bf16.vlgmr.msrb.gmra.mxu1 %v4249_v20  ;;  %v2567_v13 = vor.u32 %v3340_v6, %v2566_v5  ;;  %v3448_v52 = vld [vmem:[%s5061_s3 + $0x55c] sm:$0xf0]  ;;  %v2950_v5 = vld [vmem:[%s5061_s3 + $0x4e8] sm:$0xf]  ;;  %v2784_v14 = vld [vmem:[%s5061_s3 + $0x3b0] sm:$0xf0] }
 0x11c   :  { %1598 = vmatpush.bf16.msra.mxu2 %v2923_v16  ;;  %v2542_v16 = vld [vmem:[%s5061_s3 + $0x1b8] sm:$0xf]  ;;  %v2999_v3 = vor.u32 %v3448_v52, %v2998_v51  ;;  %v3436_v6 = vld [vmem:[%s5061_s3 + $0x4fc] sm:$0xf0]  ;;  %v3337_v18 = vld [vmem:[%s5061_s3 + $0x1ec] sm:$0xf] }
 0x11d   :  { %v2543_v26 = vor.u32 %v3334_v17, %v2542_v16  ;;  %v2951_v11 = vor.u32 %v3436_v6, %v2950_v5  ;;  %v2926_v16 = vld [vmem:[%s5061_s3 + $0x4b8] sm:$0xf]  ;;  %v3430_v17 = vld [vmem:[%s5061_s3 + $0x4cc] sm:$0xf0]  ;;  %v2568_v19 = vld [vmem:[%s5061_s3 + $0x200] sm:$0xf0] }
 0x11e   :  { %1586 = vmatpush.bf16.msra.mxu1 %v2707_v23  ;;  %1606 = vmatpush.bf16.msra.mxu3 %v2471_v24  ;;  %v2734_v23 = vld [vmem:[%s5061_s3 + $0x338] sm:$0xf]  ;;  %v3382_v24 = vld [vmem:[%s5061_s3 + $0x34c] sm:$0xf0]  ;;  %v2544_v29 = vld [vmem:[%s5061_s3 + $0x1d0] sm:$0xf0] }
 0x11f   :  { %1768 = vmatpush.bf16.msrb.mxu0 %v2339_v28  ;;  %v3328_v28 = vld [vmem:[%s5061_s3 + $0x19c] sm:$0xf0]  ;;  %v3463_v30 = vld [vmem:[%s5061_s3 + $0x5dc] sm:$0xf]  ;;  %v3413_v59 = vld [vmem:[%s5061_s3 + $0x444] sm:$0xf0] }
 0x120   :  { %1599 = vmatpush.bf16.msra.mxu2 %v2899_v43  ;;  %v2735_v43 = vor.u32 %v3382_v24, %v2734_v23  ;;  %v3385_v23 = vld [vmem:[%s5061_s3 + $0x36c] sm:$0xf]  ;;  %v2760_v24 = vld [vmem:[%s5061_s3 + $0x380] sm:$0xf0]  ;;  %v3451_v52 = vld [vmem:[%s5061_s3 + $0x57c] sm:$0xf] }
 0x121   :  { %v2763_v31 = vor.u32 %v3385_v23, %v2760_v24  ;;  %v3407_v5 = vld [vmem:[%s5061_s3 + $0x414] sm:$0xf0] }
 0x122   :  { %1618 = vmatpush.bf16.msrb.mxu1 %v2687_v27  ;;  %1607 = vmatpush.bf16.msra.mxu3 %v2447_v34  ;;  %v2518_v27 = vld [vmem:[%s5061_s3 + $0x188] sm:$0xf]  ;;  %v3376_v34 = vld [vmem:[%s5061_s3 + $0x31c] sm:$0xf0] }
 0x123   :  { %1769 = vmatmul.bf16.vlgmr.msrb.gmra.mxu0 %v4100_v40  ;;  %1600 = vmatmul.bf16.vlgmr.msra.gmra.mxu2 %v4249_v20  ;;  %v2519_v35 = vor.u32 %v3328_v28, %v2518_v27  ;;  %v3424_v27 = vld [vmem:[%s5061_s3 + $0x49c] sm:$0xf0]  ;;  %v3331_v28 = vld [vmem:[%s5061_s3 + $0x1bc] sm:$0xf] }
 0x124   :  { %1631 = vmatpush.bf16.msrb.mxu2 %v2879_v33  ;;  %v2710_v33 = vld [vmem:[%s5061_s3 + $0x308] sm:$0xf] }
 0x126   :  { %1619 = vmatpush.bf16.msrb.mxu1 %v2663_v38  ;;  %1608 = vmatpush.bf16.msra.mxu3 %v2423_v42  ;;  %v3415_v38 = vld [vmem:[%s5061_s3 + $0x45c] sm:$0xf]  ;;  %v3361_v42 = vld [vmem:[%s5061_s3 + $0x2ac] sm:$0xf] }
 0x127   :  { %v2883_v45 = vor.u32 %v3415_v38, %v2880_v25  ;;  %v2667_v50 = vor.u32 %v3361_v42, %v2664_v44  ;;  %v3325_v38 = vld [vmem:[%s5061_s3 + $0x18c] sm:$0xf]  ;;  %v2520_v25 = vld [vmem:[%s5061_s3 + $0x1a0] sm:$0xf0]  ;;  %v3371_v42 = vld [vmem:[%s5061_s3 + $0x2f4] sm:$0xf0] }
 0x128   :  { %1632 = vmatpush.bf16.msrb.mxu2 %v2855_v41  ;;  %v2711_v41 = vor.u32 %v3376_v34, %v2710_v33  ;;  %v3379_v33 = vld [vmem:[%s5061_s3 + $0x33c] sm:$0xf]  ;;  %v2736_v34 = vld [vmem:[%s5061_s3 + $0x350] sm:$0xf0]  ;;  %v3373_v44 = vld [vmem:[%s5061_s3 + $0x30c] sm:$0xf] }
 0x129   :  { %1574 = vmatmul.bf16.vlgmr.msrb.gmra.mxu3 %v4108_v46 }
 0x12a   :  { %1620 = vmatpush.bf16.msrb.mxu1 %v2639_v47  ;;  %1609 = vmatpush.bf16.msra.mxu3 %v2399_v54  ;;  %v3023_v47 = vor.u32 %v3454_v36, %v3022_v10  ;;  %v2640_v54 = vld [vmem:[%s5061_s3 + $0x290] sm:$0xf0]  ;;  %v3048_v10 = vld [vmem:[%s5061_s3 + $0x5c0] sm:$0xf0]  ;;  %v2739_v36 = vor.u32 %v3379_v33, %v2736_v34  ;;  %v2766_v34 = vld [vmem:[%s5061_s3 + $0x370] sm:$0xf] }
 0x12b   :  { %1587 = vmatmul.bf16.vlgmr.msra.gmra.mxu1 %v4232_v12 }
 0x12c   :  { %1633 = vmatpush.bf16.msrb.mxu2 %v2831_v53  ;;  %v3355_v53 = vld [vmem:[%s5061_s3 + $0x27c] sm:$0xf] }
 0x12d   :  { %v2643_v58 = vor.u32 %v3355_v53, %v2640_v54  ;;  %v3024_v53 = vld [vmem:[%s5061_s3 + $0x590] sm:$0xf0] }
 0x12e   :  { %1621 = vmatpush.bf16.msrb.mxu1 %v2615_v56  ;;  %1610 = vmatpush.bf16.msra.mxu3 %v2375_v62  ;;  %v3403_v56 = vld [vmem:[%s5061_s3 + $0x3fc] sm:$0xf]  ;;  %v2616_v62 = vld [vmem:[%s5061_s3 + $0x260] sm:$0xf0] }
 0x12f   :  { %v2835_v63 = vor.u32 %v3403_v56, %v2832_v57  ;;  %v3027_v57 = vor.u32 %v3451_v52, %v3024_v53  ;;  %v3473_v52 = vld [vmem:[%s5063_s5 + $0x28] sm:$0xff] }
 0x130   :  { %1634 = vmatpush.bf16.msrb.mxu2 %v2807_v61  ;;  %v3349_v61 = vld [vmem:[%s5061_s3 + $0x24c] sm:$0xf]  ;;  %v3329_v53 = vld [vmem:[%s5061_s3 + $0x1a4] sm:$0xf0] }
 0x131   :  { %v2619_v4 = vor.u32 %v3349_v61, %v2616_v62  ;;  %v3445_v61 = vld [vmem:[%s5061_s3 + $0x54c] sm:$0xf]  ;;  %v3000_v62 = vld [vmem:[%s5061_s3 + $0x560] sm:$0xf0] }
 0x132   :  { %1622 = vmatpush.bf16.msrb.mxu1 %v2591_v1  ;;  %1611 = vmatpush.bf16.msra.mxu3 %v2351_v8  ;;  %v3397_v1 = vld [vmem:[%s5061_s3 + $0x3cc] sm:$0xf]  ;;  %v2592_v8 = vld [vmem:[%s5061_s3 + $0x230] sm:$0xf0] }
 0x133   :  { %v2811_v9 = vor.u32 %v3397_v1, %v2808_v2  ;;  %v3003_v2 = vor.u32 %v3445_v61, %v3000_v62  ;;  %v3416_v62 = vld [vmem:[%s5061_s3 + $0x464] sm:$0xf] }
 0x134   :  { %1635 = vmatpush.bf16.msrb.mxu2 %v2783_v7  ;;  %v3343_v7 = vld [vmem:[%s5061_s3 + $0x21c] sm:$0xf] }
 0x135   :  { %v2595_v15 = vor.u32 %v3343_v7, %v2592_v8  ;;  %v3439_v7 = vld [vmem:[%s5061_s3 + $0x51c] sm:$0xf]  ;;  %v2976_v8 = vld [vmem:[%s5061_s3 + $0x530] sm:$0xf0] }
 0x136   :  { %1623 = vmatpush.bf16.msrb.mxu1 %v2567_v13  ;;  %1612 = vmatpush.bf16.msra.mxu3 %v2327_v22  ;;  %v3391_v13 = vld [vmem:[%s5061_s3 + $0x39c] sm:$0xf]  ;;  %v2927_v22 = vor.u32 %v3430_v17, %v2926_v16  ;;  %v3401_v16 = vld [vmem:[%s5061_s3 + $0x3e4] sm:$0xf0] }
 0x138   :  { %1636 = vmatpush.bf16.msrb.mxu2 %v2759_v21  ;;  %v2787_v21 = vor.u32 %v3391_v13, %v2784_v14  ;;  %v2979_v14 = vor.u32 %v3439_v7, %v2976_v8  ;;  %v2672_v7 = vld [vmem:[%s5061_s3 + $0x2c8] sm:$0xf0] }
 0x139   :  { %1613 = vmatmul.bf16.vlgmr.msra.gmra.mxu3 %v4100_v40  ;;  %v2856_v40 = vld [vmem:[%s5061_s3 + $0x440] sm:$0xf0] }
 0x13a   :  { %1624 = vmatpush.bf16.msrb.mxu1 %v2543_v26  ;;  %1644 = vmatpush.bf16.msrb.mxu3 %v3071_v48  ;;  %v2859_v55 = vor.u32 %v3409_v49, %v2856_v40  ;;  %v2571_v26 = vor.u32 %v3337_v18, %v2568_v19  ;;  %v2902_v48 = vld [vmem:[%s5061_s3 + $0x488] sm:$0xf]  ;;  %v2886_v40 = vld [vmem:[%s5061_s3 + $0x460] sm:$0xf]  ;;  %v3433_v18 = vld [vmem:[%s5061_s3 + $0x4ec] sm:$0xf] }
 0x13b   :  { %v2903_v32 = vor.u32 %v3424_v27, %v2902_v48  ;;  %v2952_v19 = vld [vmem:[%s5061_s3 + $0x500] sm:$0xf0]  ;;  %v3395_v48 = vld [vmem:[%s5061_s3 + $0x3b4] sm:$0xf0] }
 0x13c   :  { %1637 = vmatpush.bf16.msrb.mxu2 %v2735_v43  ;;  %v3072_v43 = vld [vmem:[%s5061_s3 + $0x5f0] sm:$0xf0]  ;;  %v2955_v24 = vor.u32 %v3433_v18, %v2952_v19  ;;  %v3356_v18 = vld [vmem:[%s5061_s3 + $0x284] sm:$0xf]  ;;  %v2648_v19 = vld [vmem:[%s5061_s3 + $0x298] sm:$0xf0] }
 0x13e   :  { %1625 = vmatpush.bf16.msrb.mxu1 %v2519_v35  ;;  %1645 = vmatpush.bf16.msrb.mxu3 %v3047_v37  ;;  %v2547_v35 = vor.u32 %v3331_v28, %v2544_v29  ;;  %v3075_v37 = vor.u32 %v3463_v30, %v3072_v43  ;;  %v3427_v28 = vld [vmem:[%s5061_s3 + $0x4bc] sm:$0xf]  ;;  %v2928_v29 = vld [vmem:[%s5061_s3 + $0x4d0] sm:$0xf0]  ;;  %v2574_v43 = vld [vmem:[%s5061_s3 + $0x1f0] sm:$0xf] }
 0x13f   :  { %v3475_v30 = vld [vmem:[%s5063_s5 + $0x38] sm:$0xff]  ;;  %v2931_v33 = vor.u32 %v3427_v28, %v2928_v29  ;;  %v2982_v28 = vld [vmem:[%s5061_s3 + $0x520] sm:$0xf] }
 0x140   :  { %1638 = vmatpush.bf16.msrb.mxu2 %v2711_v41  ;;  %v2694_v41 = vld [vmem:[%s5061_s3 + $0x2e0] sm:$0xf]  ;;  %2213 = vmatpush.bf16.msra.mxu0 %v3475_v30  ;;  %v3443_v29 = vld [vmem:[%s5061_s3 + $0x534] sm:$0xf0] }
 0x141   :  { %1626 = vmatmul.bf16.vlgmr.msrb.gmra.mxu1 %v4108_v46  ;;  %v2695_v51 = vor.u32 %v3371_v42, %v2694_v41  ;;  %v3078_v41 = vld [vmem:[%s5061_s3 + $0x5e0] sm:$0xf]  ;;  %v3467_v42 = vld [vmem:[%s5061_s3 + $0x5f4] sm:$0xf0] }
 0x142   :  { %1670 = vmatpush.bf16.msra.mxu1 %v2691_v39  ;;  %1646 = vmatpush.bf16.msrb.mxu3 %v3023_v47  ;;  %v3457_v39 = vld [vmem:[%s5061_s3 + $0x5ac] sm:$0xf]  ;;  %v2523_v47 = vor.u32 %v3325_v38, %v2520_v25  ;;  %v2904_v25 = vld [vmem:[%s5061_s3 + $0x4a0] sm:$0xf0] }
 0x143   :  { %1639 = vmatmul.bf16.vlgmr.msrb.gmra.mxu2 %v4232_v12  ;;  %v3051_v49 = vor.u32 %v3457_v39, %v3048_v10  ;;  %v2550_v39 = vld [vmem:[%s5061_s3 + $0x1c0] sm:$0xf]  ;;  %v3474_v10 = vld [vmem:[%s5063_s5 + $0x30] sm:$0xff] }
 0x144   :  { %1683 = vmatpush.bf16.msra.mxu2 %v2883_v45  ;;  %v2712_v45 = vld [vmem:[%s5061_s3 + $0x320] sm:$0xf0]  ;;  %2214 = vmatpush.bf16.msra.mxu0 %v3474_v10  ;;  %v2958_v10 = vld [vmem:[%s5061_s3 + $0x4f0] sm:$0xf] }
 0x145   :  { %v2715_v54 = vor.u32 %v3373_v44, %v2712_v45 }
 0x146   :  { %1671 = vmatpush.bf16.msra.mxu1 %v2667_v50  ;;  %1647 = vmatpush.bf16.msrb.mxu3 %v2999_v3  ;;  %v3419_v50 = vld [vmem:[%s5061_s3 + $0x474] sm:$0xf0]  ;;  %v3365_v3 = vld [vmem:[%s5061_s3 + $0x2c4] sm:$0xf0] }
 0x147   :  { %v2887_v56 = vor.u32 %v3419_v50, %v2886_v40  ;;  %v3079_v50 = vor.u32 %v3467_v42, %v3078_v41  ;;  %v3344_v42 = vld [vmem:[%s5061_s3 + $0x224] sm:$0xf] }
 0x148   :  { %1684 = vmatpush.bf16.msra.mxu2 %v2859_v55  ;;  %v2670_v55 = vld [vmem:[%s5061_s3 + $0x2b0] sm:$0xf]  ;;  %2215 = vmatpush.bf16.msra.mxu0 %v3473_v52  ;;  %v2934_v52 = vld [vmem:[%s5061_s3 + $0x4c0] sm:$0xf] }
 0x149   :  { %v2671_v60 = vor.u32 %v3365_v3, %v2670_v55  ;;  %v3461_v55 = vld [vmem:[%s5061_s3 + $0x5c4] sm:$0xf0] }
 0x14a   :  { %1672 = vmatpush.bf16.msra.mxu1 %v2643_v58  ;;  %1648 = vmatpush.bf16.msrb.mxu3 %v2975_v0  ;;  %v2862_v58 = vld [vmem:[%s5061_s3 + $0x430] sm:$0xf]  ;;  %v3359_v0 = vld [vmem:[%s5061_s3 + $0x294] sm:$0xf0] }
 0x14b   :  { %v2863_v1 = vor.u32 %v3413_v59, %v2862_v58  ;;  %v2718_v58 = vld [vmem:[%s5061_s3 + $0x310] sm:$0xf]  ;;  %v3377_v59 = vld [vmem:[%s5061_s3 + $0x324] sm:$0xf0] }
 0x14c   :  { %1685 = vmatpush.bf16.msra.mxu2 %v2835_v63  ;;  %v2646_v63 = vld [vmem:[%s5061_s3 + $0x280] sm:$0xf] }
 0x14d   :  { %v2647_v6 = vor.u32 %v3359_v0, %v2646_v63  ;;  %v2888_v63 = vld [vmem:[%s5061_s3 + $0x478] sm:$0xf0]  ;;  %v3472_v0 = vld [vmem:[%s5063_s5 + $0x20] sm:$0xff] }
 0x14e   :  { %1673 = vmatpush.bf16.msra.mxu1 %v2619_v4  ;;  %1649 = vmatpush.bf16.msrb.mxu3 %v2951_v11  ;;  %v2838_v4 = vld [vmem:[%s5061_s3 + $0x400] sm:$0xf]  ;;  %v3353_v11 = vld [vmem:[%s5061_s3 + $0x264] sm:$0xf0]  ;;  %v2891_v8 = vor.u32 %v3416_v62, %v2888_v63  ;;  %v2910_v62 = vld [vmem:[%s5061_s3 + $0x490] sm:$0xf] }
 0x14f   :  { %v2839_v13 = vor.u32 %v3407_v5, %v2838_v4  ;;  %v3455_v4 = vld [vmem:[%s5061_s3 + $0x594] sm:$0xf0]  ;;  %v2719_v5 = vor.u32 %v3377_v59, %v2718_v58  ;;  %2216 = vmatpush.bf16.msra.mxu0 %v3472_v0  ;;  %v2768_v58 = vld [vmem:[%s5061_s3 + $0x388] sm:$0xf0]  ;;  %v3425_v63 = vld [vmem:[%s5061_s3 + $0x4a4] sm:$0xf0] }
 0x150   :  { %1686 = vmatpush.bf16.msra.mxu2 %v2811_v9  ;;  %v2622_v9 = vld [vmem:[%s5061_s3 + $0x250] sm:$0xf]  ;;  %v3332_v0 = vld [vmem:[%s5061_s3 + $0x1c4] sm:$0xf] }
 0x151   :  { %v2623_v17 = vor.u32 %v3353_v11, %v2622_v9  ;;  %v3410_v11 = vld [vmem:[%s5061_s3 + $0x434] sm:$0xf] }
 0x152   :  { %1674 = vmatpush.bf16.msra.mxu1 %v2595_v15  ;;  %1650 = vmatpush.bf16.msrb.mxu3 %v2927_v22  ;;  %v2814_v15 = vld [vmem:[%s5061_s3 + $0x3d0] sm:$0xf]  ;;  %v3347_v22 = vld [vmem:[%s5061_s3 + $0x234] sm:$0xf0] }
 0x153   :  { %v2815_v23 = vor.u32 %v3401_v16, %v2814_v15  ;;  %v3006_v16 = vld [vmem:[%s5061_s3 + $0x550] sm:$0xf] }
 0x154   :  { %1687 = vmatpush.bf16.msra.mxu2 %v2787_v21  ;;  %v2598_v21 = vld [vmem:[%s5061_s3 + $0x220] sm:$0xf] }
 0x155   :  { %v2599_v27 = vor.u32 %v3347_v22, %v2598_v21  ;;  %v4757_v22 = vld [vmem:[%s5062_s4] sm:$0x3f] }
 0x156   :  { %1675 = vmatpush.bf16.msra.mxu1 %v2571_v26  ;;  %1651 = vmatpush.bf16.msrb.mxu3 %v2903_v32  ;;  %v2790_v26 = vld [vmem:[%s5061_s3 + $0x3a0] sm:$0xf]  ;;  %v532_v30 = vperm.slane %v4757_v22, 3 }
 0x157   :  { %v2791_v32 = vor.u32 %v3395_v48, %v2790_v26  ;;  %v2840_v26 = vld [vmem:[%s5061_s3 + $0x418] sm:$0xf0]  ;;  %v3470_v48 = vld [vmem:[%s5063_s5 + $0x10] sm:$0xff] }
 0x158   :  { %1688 = vmatpush.bf16.msra.mxu2 %v2763_v31  ;;  %v3341_v31 = vld [vmem:[%s5061_s3 + $0x204] sm:$0xf0] }
 0x159   :  { %1652 = vmatmul.bf16.vlgmr.msrb.gmra.mxu3 %v4249_v20  ;;  %v2575_v38 = vor.u32 %v3341_v31, %v2574_v43  ;;  %v3350_v43 = vld [vmem:[%s5061_s3 + $0x254] sm:$0xf]  ;;  %v2624_v31 = vld [vmem:[%s5061_s3 + $0x268] sm:$0xf0] }
 0x15a   :  { %1676 = vmatpush.bf16.msra.mxu1 %v2547_v35  ;;  %1696 = vmatpush.bf16.msra.mxu3 %v3075_v37  ;;  %v3389_v35 = vld [vmem:[%s5061_s3 + $0x384] sm:$0xf0]  ;;  %v3421_v37 = vld [vmem:[%s5061_s3 + $0x48c] sm:$0xf] }
 0x15b   :  { %v2767_v44 = vor.u32 %v3389_v35, %v2766_v34  ;;  %v2907_v45 = vor.u32 %v3421_v37, %v2904_v25  ;;  %v3398_v34 = vld [vmem:[%s5061_s3 + $0x3d4] sm:$0xf]  ;;  %v2816_v35 = vld [vmem:[%s5061_s3 + $0x3e8] sm:$0xf0] }
 0x15c   :  { %1689 = vmatpush.bf16.msra.mxu2 %v2739_v36  ;;  %v3335_v36 = vld [vmem:[%s5061_s3 + $0x1d4] sm:$0xf0]  ;;  %v3469_v37 = vld [vmem:[%s5063_s5 + $0x8] sm:$0xff] }
 0x15d   :  { %v2551_v40 = vor.u32 %v3335_v36, %v2550_v39  ;;  %v2627_v39 = vor.u32 %v3350_v43, %v2624_v31  ;;  %v3437_v36 = vld [vmem:[%s5061_s3 + $0x504] sm:$0xf0] }
 0x15e   :  { %1677 = vmatpush.bf16.msra.mxu1 %v2523_v47  ;;  %1697 = vmatpush.bf16.msra.mxu3 %v3051_v49  ;;  %v2742_v47 = vld [vmem:[%s5061_s3 + $0x340] sm:$0xf]  ;;  %v3383_v49 = vld [vmem:[%s5061_s3 + $0x354] sm:$0xf0] }
 0x15f   :  { %v2743_v3 = vor.u32 %v3383_v49, %v2742_v47  ;;  %v2959_v47 = vor.u32 %v3437_v36, %v2958_v10  ;;  %v3392_v49 = vld [vmem:[%s5061_s3 + $0x3a4] sm:$0xf] }
 0x160   :  { %1690 = vmatpush.bf16.msra.mxu2 %v2715_v54  ;;  %v3054_v54 = vld [vmem:[%s5061_s3 + $0x5b0] sm:$0xf]  ;;  %v3440_v36 = vld [vmem:[%s5061_s3 + $0x524] sm:$0xf] }
 0x161   :  { %1678 = vmatmul.bf16.vlgmr.msra.gmra.mxu1 %v4108_v46  ;;  %v3055_v61 = vor.u32 %v3461_v55, %v3054_v54  ;;  %v3338_v54 = vld [vmem:[%s5061_s3 + $0x1f4] sm:$0xf]  ;;  %v2576_v55 = vld [vmem:[%s5061_s3 + $0x208] sm:$0xf0] }
 0x162   :  { %1722 = vmatpush.bf16.msrb.mxu1 %v2695_v51  ;;  %1698 = vmatpush.bf16.msra.mxu3 %v3027_v57  ;;  %v2526_v51 = vld [vmem:[%s5061_s3 + $0x190] sm:$0xf]  ;;  %v2696_v57 = vld [vmem:[%s5061_s3 + $0x2f8] sm:$0xf0] }
 0x163   :  { %1691 = vmatmul.bf16.vlgmr.msra.gmra.mxu2 %v4232_v12 }
 0x164   :  { %1735 = vmatpush.bf16.msrb.mxu2 %v2887_v56  ;;  %v3368_v56 = vld [vmem:[%s5061_s3 + $0x2e4] sm:$0xf] }
 0x166   :  { %1723 = vmatpush.bf16.msrb.mxu1 %v2671_v60  ;;  %1699 = vmatpush.bf16.msra.mxu3 %v3003_v2  ;;  %v2527_v60 = vor.u32 %v3329_v53, %v2526_v51  ;;  %v3030_v2 = vld [vmem:[%s5061_s3 + $0x580] sm:$0xf]  ;;  %v3431_v53 = vld [vmem:[%s5061_s3 + $0x4d4] sm:$0xf0] }
 0x167   :  { %v3031_v9 = vor.u32 %v3455_v4, %v3030_v2  ;;  %v2552_v2 = vld [vmem:[%s5061_s3 + $0x1d8] sm:$0xf0]  ;;  %v3464_v4 = vld [vmem:[%s5061_s3 + $0x5e4] sm:$0xf] }
 0x168   :  { %1736 = vmatpush.bf16.msrb.mxu2 %v2863_v1  ;;  %v2699_v1 = vor.u32 %v3368_v56, %v2696_v57  ;;  %v2935_v56 = vor.u32 %v3431_v53, %v2934_v52  ;;  %v3386_v57 = vld [vmem:[%s5061_s3 + $0x374] sm:$0xf]  ;;  %v3491_v53 = vld [vmem:[%s5063_s5 + $0xb8] sm:$0xff] }
 0x16a   :  { %1724 = vmatpush.bf16.msrb.mxu1 %v2647_v6  ;;  %1700 = vmatpush.bf16.msra.mxu3 %v2979_v14  ;;  %v3362_v6 = vld [vmem:[%s5061_s3 + $0x2b4] sm:$0xf]  ;;  %v3471_v14 = vld [vmem:[%s5063_s5 + $0x18] sm:$0xff] }
 0x16b   :  { %v2675_v15 = vor.u32 %v3362_v6, %v2672_v7  ;;  %2217 = vmatpush.bf16.msra.mxu0 %v3471_v14  ;;  %v2771_v6 = vor.u32 %v3386_v57, %v2768_v58  ;;  %v2911_v7 = vor.u32 %v3425_v63, %v2910_v62  ;;  %v3326_v14 = vld [vmem:[%s5061_s3 + $0x194] sm:$0xf]  ;;  %v3428_v57 = vld [vmem:[%s5061_s3 + $0x4c4] sm:$0xf]  ;;  %v2936_v58 = vld [vmem:[%s5061_s3 + $0x4d8] sm:$0xf0] }
 0x16c   :  { %1737 = vmatpush.bf16.msrb.mxu2 %v2839_v13  ;;  %v2864_v13 = vld [vmem:[%s5061_s3 + $0x448] sm:$0xf0]  ;;  %v2939_v63 = vor.u32 %v3428_v57, %v2936_v58 }
 0x16d   :  { %v2867_v21 = vor.u32 %v3410_v11, %v2864_v13  ;;  %v2555_v11 = vor.u32 %v3332_v0, %v2552_v2  ;;  %v3422_v0 = vld [vmem:[%s5061_s3 + $0x494] sm:$0xf]  ;;  %v2912_v2 = vld [vmem:[%s5061_s3 + $0x4a8] sm:$0xf0] }
 0x16e   :  { %1725 = vmatpush.bf16.msrb.mxu1 %v2623_v17  ;;  %1701 = vmatpush.bf16.msra.mxu3 %v2955_v24  ;;  %v3449_v17 = vld [vmem:[%s5061_s3 + $0x564] sm:$0xf0]  ;;  %v3404_v24 = vld [vmem:[%s5061_s3 + $0x404] sm:$0xf] }
 0x16f   :  { %2218 = vmatpush.bf16.msra.mxu0 %v3470_v48 }
 0x170   :  { %1738 = vmatpush.bf16.msrb.mxu2 %v2815_v23  ;;  %v3007_v23 = vor.u32 %v3449_v17, %v3006_v16  ;;  %v3458_v16 = vld [vmem:[%s5061_s3 + $0x5b4] sm:$0xf]  ;;  %v3056_v17 = vld [vmem:[%s5061_s3 + $0x5c8] sm:$0xf0] }
 0x171   :  { %v3059_v48 = vor.u32 %v3458_v16, %v3056_v17  ;;  %v3476_v17 = vld [vmem:[%s5063_s5 + $0x40] sm:$0xff] }
 0x172   :  { %1726 = vmatpush.bf16.msrb.mxu1 %v2599_v27  ;;  %1702 = vmatpush.bf16.msra.mxu3 %v2931_v33  ;;  %v2651_v27 = vor.u32 %v3356_v18, %v2648_v19  ;;  %v2983_v33 = vor.u32 %v3443_v29, %v2982_v28  ;;  %v533_v18 = vperm.slane %v4757_v22, 4  ;;  %v3452_v28 = vld [vmem:[%s5061_s3 + $0x584] sm:$0xf]  ;;  %v3032_v29 = vld [vmem:[%s5061_s3 + $0x598] sm:$0xf0] }
 0x173   :  { %2219 = vmatpush.bf16.msra.mxu0 %v3469_v37  ;;  %v529_v37 = vperm.slane %v4757_v22, 0 }
 0x174   :  { %1739 = vmatpush.bf16.msrb.mxu2 %v2791_v32  ;;  %v2843_v32 = vor.u32 %v3404_v24, %v2840_v26 }
 0x176   :  { %1727 = vmatpush.bf16.msrb.mxu1 %v2575_v38  ;;  %1703 = vmatpush.bf16.msra.mxu3 %v2907_v45  ;;  %v2819_v45 = vor.u32 %v3398_v34, %v2816_v35  ;;  %v3008_v34 = vld [vmem:[%s5061_s3 + $0x568] sm:$0xf0]  ;;  %v3482_v35 = vld [vmem:[%s5063_s5 + $0x70] sm:$0xff] }
 0x178   :  { %1740 = vmatpush.bf16.msrb.mxu2 %v2767_v44  ;;  %v2600_v44 = vld [vmem:[%s5061_s3 + $0x238] sm:$0xf0] }
 0x179   :  { %1704 = vmatmul.bf16.vlgmr.msra.gmra.mxu3 %v4249_v20  ;;  %v2603_v51 = vor.u32 %v3344_v42, %v2600_v44  ;;  %v2984_v42 = vld [vmem:[%s5061_s3 + $0x538] sm:$0xf0]  ;;  %v3481_v44 = vld [vmem:[%s5063_s5 + $0x68] sm:$0xff] }
 0x17a   :  { %1728 = vmatpush.bf16.msrb.mxu1 %v2551_v40  ;;  %1748 = vmatpush.bf16.msrb.mxu3 %v3079_v50  ;;  %v2792_v40 = vld [vmem:[%s5061_s3 + $0x3b8] sm:$0xf0]  ;;  %v3468_v50 = vld [vmem:[%s5063_s5] sm:$0xff] }
 0x17b   :  { %2220 = vmatpush.bf16.msra.mxu0 %v3468_v50  ;;  %v3480_v50 = vld [vmem:[%s5063_s5 + $0x60] sm:$0xff] }
 0x17c   :  { %1741 = vmatpush.bf16.msrb.mxu2 %v2743_v3  ;;  %v2795_v3 = vor.u32 %v3392_v49, %v2792_v40  ;;  %v3434_v49 = vld [vmem:[%s5061_s3 + $0x4f4] sm:$0xf]  ;;  %v2960_v40 = vld [vmem:[%s5061_s3 + $0x508] sm:$0xf0] }
 0x17e   :  { %1729 = vmatpush.bf16.msrb.mxu1 %v2527_v60  ;;  %1749 = vmatpush.bf16.msrb.mxu3 %v3055_v61  ;;  %v4791_v38 = vpop.f32.mrf.mxu1  ;;  %v1666_v25 = vpop.f32.mrf.mxu0  ;;  %v2579_v61 = vor.u32 %v3338_v54, %v2576_v55  ;;  %v2963_v55 = vor.u32 %v3434_v49, %v2960_v40  ;;  %v3493_v49 = vld [vmem:[%s5063_s5 + $0xc8] sm:$0xff] }
 0x17f   :  { %v4799_v41 = vadd.f32 %v1666_v25, %v532_v30  ;;  %v3483_v30 = vld [vmem:[%s5063_s5 + $0x78] sm:$0xff] }
 0x180   :  { %1742 = vmatpush.bf16.msrb.mxu2 %v2719_v5  ;;  %v3080_v5 = vld [vmem:[%s5061_s3 + $0x5f8] sm:$0xf0] }
 0x181   :  { %1730 = vmatmul.bf16.vlgmr.msrb.gmra.mxu1 %v4108_v46  ;;  %v3083_v13 = vor.u32 %v3464_v4, %v3080_v5  ;;  %v3478_v4 = vld [vmem:[%s5063_s5 + $0x50] sm:$0xff] }
 0x182   :  { %1774 = vmatpush.bf16.msra.mxu1 %v2699_v1  ;;  %1750 = vmatpush.bf16.msrb.mxu3 %v3031_v9  ;;  %v2744_v9 = vld [vmem:[%s5061_s3 + $0x358] sm:$0xf0]  ;;  %v3490_v5 = vld [vmem:[%s5063_s5 + $0xb0] sm:$0xff] }
 0x183   :  { %1743 = vmatmul.bf16.vlgmr.msrb.gmra.mxu2 %v4232_v12 }
 0x184   :  { %1787 = vmatpush.bf16.msra.mxu2 %v2891_v8  ;;  %v3380_v8 = vld [vmem:[%s5061_s3 + $0x344] sm:$0xf] }
 0x185   :  { %v2747_v19 = vor.u32 %v3380_v8, %v2744_v9  ;;  %v2915_v9 = vor.u32 %v3422_v0, %v2912_v2  ;;  %v3502_v0 = vld [vmem:[%s5063_s5 + $0x110] sm:$0xff] }
 0x186   :  { %1775 = vmatpush.bf16.msra.mxu1 %v2675_v15  ;;  %1751 = vmatpush.bf16.msrb.mxu3 %v3007_v23  ;;  %v1512_v59 = vpop.f32.mrf.mxu1  ;;  %v4834_v60 = vpop.f32.mrf.mxu2  ;;  %v2528_v15 = vld [vmem:[%s5061_s3 + $0x1a8] sm:$0xf0] }
 0x187   :  { %v1668_v1 = vpop.f32.mrf.mxu0  ;;  %v2720_v23 = vld [vmem:[%s5061_s3 + $0x328] sm:$0xf0]  ;;  %v2531_v26 = vor.u32 %v3326_v14, %v2528_v15  ;;  %v3479_v59 = vld [vmem:[%s5063_s5 + $0x58] sm:$0xff] }
 0x188   :  { %1788 = vmatpush.bf16.msra.mxu2 %v2867_v21  ;;  %v3374_v21 = vld [vmem:[%s5061_s3 + $0x314] sm:$0xf]  ;;  %v3477_v14 = vld [vmem:[%s5063_s5 + $0x48] sm:$0xff] }
 0x189   :  { %v2723_v31 = vor.u32 %v3374_v21, %v2720_v23  ;;  %v3487_v23 = vld [vmem:[%s5063_s5 + $0x98] sm:$0xff] }
 0x18a   :  { %1776 = vmatpush.bf16.msra.mxu1 %v2651_v27  ;;  %1752 = vmatpush.bf16.msrb.mxu3 %v2983_v33  ;;  %v3446_v33 = vld [vmem:[%s5061_s3 + $0x554] sm:$0xf] }
 0x18c   :  { %1789 = vmatpush.bf16.msra.mxu2 %v2843_v32  ;;  %v3035_v32 = vor.u32 %v3452_v28, %v3032_v29  ;;  %v3486_v28 = vld [vmem:[%s5063_s5 + $0x90] sm:$0xff] }
 0x18e   :  { %1777 = vmatpush.bf16.msra.mxu1 %v2627_v39  ;;  %1753 = vmatpush.bf16.msrb.mxu3 %v2959_v47  ;;  %v1525_v24 = vpop.f32.mrf.mxu2  ;;  %v3011_v39 = vor.u32 %v3446_v33, %v3008_v34  ;;  %v2987_v47 = vor.u32 %v3440_v36, %v2984_v42  ;;  %v3484_v33 = vld [vmem:[%s5063_s5 + $0x80] sm:$0xff] }
 0x18f   :  { %v1718_v27 = vpop.f32.mrf.mxu0  ;;  %v3496_v42 = vld [vmem:[%s5063_s5 + $0xe0] sm:$0xff] }
 0x190   :  { %1790 = vmatpush.bf16.msra.mxu2 %v2819_v45  ;;  %v4888_v43 = vadd.f32 %v1718_v27, %v533_v18  ;;  %v1511_v45 = vadd.f32 %v4791_v38, %v529_v37  ;;  %v534_v38 = vperm.slane %v4757_v22, 5  ;;  %v3488_v18 = vld [vmem:[%s5063_s5 + $0xa0] sm:$0xff]  ;;  %v3498_v37 = vld [vmem:[%s5063_s5 + $0xf0] sm:$0xff] }
 0x192   :  { %1778 = vmatpush.bf16.msra.mxu1 %v2603_v51  ;;  %1754 = vmatpush.bf16.msrb.mxu3 %v2935_v56 }
 0x194   :  { %1791 = vmatpush.bf16.msra.mxu2 %v2795_v3 }
 0x196   :  { %1779 = vmatpush.bf16.msra.mxu1 %v2579_v61  ;;  %1755 = vmatpush.bf16.msrb.mxu3 %v2911_v7  ;;  %v1562_v25 = vpop.f32.mrf.mxu2  ;;  %v3489_v7 = vld [vmem:[%s5063_s5 + $0xa8] sm:$0xff] }
 0x197   :  { %v1720_v10 = vpop.f32.mrf.mxu0 }
 0x198   :  { %1792 = vmatpush.bf16.msra.mxu2 %v2771_v6 }
 0x199   :  { %1756 = vmatmul.bf16.vlgmr.msrb.gmra.mxu3 %v4249_v20 }
 0x19a   :  { %1780 = vmatpush.bf16.msra.mxu1 %v2555_v11  ;;  %1800 = vmatpush.bf16.msra.mxu3 %v3083_v13  ;;  %v530_v11 = vperm.slane %v4757_v22, 1 }
 0x19c   :  { %1793 = vmatpush.bf16.msra.mxu2 %v2747_v19  ;;  %v1536_v51 = vpop.f32.mrf.mxu3  ;;  %v1563_v16 = vadd.f32 %v1562_v25, %v530_v11  ;;  %v3497_v25 = vld [vmem:[%s5063_s5 + $0xe8] sm:$0xff] }
 0x19e   :  { %1781 = vmatpush.bf16.msra.mxu1 %v2531_v26  ;;  %1801 = vmatpush.bf16.msra.mxu3 %v3059_v48  ;;  %v1564_v54 = vpop.f32.mrf.mxu2 }
 0x1a0   :  { %1794 = vmatpush.bf16.msra.mxu2 %v2723_v31  ;;  %v1770_v56 = vpop.f32.mrf.mxu0 }
 0x1a1   :  { %1782 = vmatmul.bf16.vlgmr.msra.gmra.mxu1 %v4108_v46  ;;  %v1549_v46 = vpop.f32.mrf.mxu1 }
 0x1a2   :  { %2226 = vmatpush.bf16.msrb.mxu1 %v3483_v30  ;;  %1802 = vmatpush.bf16.msra.mxu3 %v3035_v32 }
 0x1a3   :  { %1795 = vmatmul.bf16.vlgmr.msra.gmra.mxu2 %v4232_v12  ;;  %v1524_v12 = vadd.f32 %v4834_v60, %v1511_v45  ;;  %v4936_v60 = vadd.f32 %v1770_v56, %v534_v38  ;;  %v531_v45 = vperm.slane %v4757_v22, 2  ;;  %v3492_v38 = vld [vmem:[%s5063_s5 + $0xc0] sm:$0xff]  ;;  %v3505_v56 = vld [vmem:[%s5063_s5 + $0x128] sm:$0xff] }
 0x1a4   :  { %2239 = vmatpush.bf16.msrb.mxu2 %v3491_v53  ;;  %v1538_v6 = vpop.f32.mrf.mxu3 }
 0x1a5   :  { %v1537_v52 = vadd.f32 %v1536_v51, %v1524_v12  ;;  %v3500_v6 = vld [vmem:[%s5063_s5 + $0x100] sm:$0xff] }
 0x1a6   :  { %2227 = vmatpush.bf16.msrb.mxu1 %v3482_v35  ;;  %1803 = vmatpush.bf16.msra.mxu3 %v3011_v39  ;;  %v1601_v8 = vpop.f32.mrf.mxu2  ;;  %v3499_v35 = vld [vmem:[%s5063_s5 + $0xf8] sm:$0xff] }
 0x1a7   :  { %v1550_v3 = vadd.f32 %v1549_v46, %v1537_v52  ;;  %v3507_v52 = vld [vmem:[%s5063_s5 + $0x138] sm:$0xff] }
 0x1a8   :  { %2240 = vmatpush.bf16.msrb.mxu2 %v3490_v5  ;;  %v1772_v13 = vpop.f32.mrf.mxu0  ;;  %2265 = vmatpush.bf16.msrb.mxu0 %v3507_v52 }
 0x1a9   :  { %v1551_v61 = vpop.f32.mrf.mxu1  ;;  %v1813_v62 = vmax.f32 %v1550_v3, 0.0 }
 0x1aa   :  { %2228 = vmatpush.bf16.msrb.mxu1 %v3481_v44  ;;  %1804 = vmatpush.bf16.msra.mxu3 %v2987_v47  ;;  %v3495_v44 = vld [vmem:[%s5063_s5 + $0xd8] sm:$0xff]  ;;  %v3494_v47 = vld [vmem:[%s5063_s5 + $0xd0] sm:$0xff]  ;;  %v3504_v61 = vld [vmem:[%s5063_s5 + $0x120] sm:$0xff] }
 0x1ab   :  { %v1819_v1 = vpack.c.bf16 %v1813_v62, %v1813_v62  ;;  %v3503_v62 = vld [vmem:[%s5063_s5 + $0x118] sm:$0xff] }
 0x1ac   :  { %2241 = vmatpush.bf16.msrb.mxu2 %v3489_v7  ;;  %v1575_v19 = vpop.f32.mrf.mxu3 }
 0x1ad   :  { %2221 = vmatmul.bf16.vlgmr.msra.gmra.mxu0 %v1819_v1  ;;  %v1576_v21 = vadd.f32 %v1575_v19, %v1563_v16  ;;  %v3501_v1 = vld [vmem:[%s5063_s5 + $0x108] sm:$0xff]  ;;  %v3511_v19 = vld [vmem:[%s5063_s5 + $0x158] sm:$0xff] }
 0x1ae   :  { %2229 = vmatpush.bf16.msrb.mxu1 %v3480_v50  ;;  %1805 = vmatpush.bf16.msra.mxu3 %v2963_v55  ;;  %v1603_v24 = vpop.f32.mrf.mxu2  ;;  %v3506_v55 = vld [vmem:[%s5063_s5 + $0x130] sm:$0xff] }
 0x1af   :  { %2266 = vmatpush.bf16.msrb.mxu0 %v3506_v55  ;;  %v3509_v24 = vld [vmem:[%s5063_s5 + $0x148] sm:$0xff] }
 0x1b0   :  { %2242 = vmatpush.bf16.msrb.mxu2 %v3488_v18  ;;  %v3512_v18 = vld [vmem:[%s5063_s5 + $0x160] sm:$0xff] }
 0x1b1   :  { %v1588_v15 = vpop.f32.mrf.mxu1 }
 0x1b2   :  { %2230 = vmatpush.bf16.msrb.mxu1 %v3479_v59  ;;  %1806 = vmatpush.bf16.msra.mxu3 %v2939_v63  ;;  %v1589_v26 = vadd.f32 %v1588_v15, %v1576_v21 }
 0x1b3   :  { %2267 = vmatpush.bf16.msrb.mxu0 %v3505_v56 }
 0x1b4   :  { %v1602_v48 = vadd.f32 %v1601_v8, %v1589_v26  ;;  %2243 = vmatpush.bf16.msrb.mxu2 %v3487_v23  ;;  %v1577_v30 = vpop.f32.mrf.mxu3  ;;  %v3515_v8 = vld [vmem:[%s5063_s5 + $0x178] sm:$0xff]  ;;  %v3510_v23 = vld [vmem:[%s5063_s5 + $0x150] sm:$0xff] }
 0x1b6   :  { %2231 = vmatpush.bf16.msrb.mxu1 %v3478_v4  ;;  %1807 = vmatpush.bf16.msra.mxu3 %v2915_v9  ;;  %v1814_v29 = vmax.f32 %v1602_v48, 0.0 }
 0x1b7   :  { %2268 = vmatpush.bf16.msrb.mxu0 %v3504_v61 }
 0x1b8   :  { %v1820_v31 = vpack.c.bf16 %v1814_v29, %v1814_v29  ;;  %2244 = vmatpush.bf16.msrb.mxu2 %v3486_v28  ;;  %v3508_v28 = vld [vmem:[%s5063_s5 + $0x140] sm:$0xff] }
 0x1b9   :  { %1808 = vmatmul.bf16.vlgmr.msra.gmra.mxu3 %v4249_v20  ;;  %v1590_v27 = vpop.f32.mrf.mxu1  ;;  %v3485_v20 = vld [vmem:[%s5063_s5 + $0x88] sm:$0xff] }
 0x1ba   :  { %2232 = vmatpush.bf16.msrb.mxu1 %v3477_v14  ;;  %2252 = vmatpush.bf16.msrb.mxu3 %v3499_v35  ;;  %v3513_v14 = vld [vmem:[%s5063_s5 + $0x168] sm:$0xff] }
 0x1bb   :  { %2269 = vmatpush.bf16.msrb.mxu0 %v3503_v62 }
 0x1bc   :  { %2245 = vmatpush.bf16.msrb.mxu2 %v3485_v20  ;;  %v1614_v34 = vpop.f32.mrf.mxu3 }
 0x1bd   :  { %v1615_v12 = vadd.f32 %v1614_v34, %v531_v45 }
 0x1be   :  { %2233 = vmatpush.bf16.msrb.mxu1 %v3476_v17  ;;  %2253 = vmatpush.bf16.msrb.mxu3 %v3498_v37 }
 0x1bf   :  { %2270 = vmatpush.bf16.msrb.mxu0 %v3502_v0 }
 0x1c0   :  { %2246 = vmatpush.bf16.msrb.mxu2 %v3484_v33 }
 0x1c1   :  { %2234 = vmatmul.bf16.vlgmr.msrb.gmra.mxu1 %v1820_v31  ;;  %v1627_v32 = vpop.f32.mrf.mxu1 }
 0x1c2   :  { %2254 = vmatpush.bf16.msrb.mxu3 %v3497_v25  ;;  %v1628_v40 = vadd.f32 %v1627_v32, %v1615_v12  ;;  %2278 = vmatpush.bf16.msra.mxu1 %v3515_v8 }
 0x1c3   :  { %2271 = vmatpush.bf16.msrb.mxu0 %v3501_v1 }
 0x1c4   :  { %v1616_v36 = vpop.f32.mrf.mxu3 }
 0x1c6   :  { %v1640_v10 = vpop.f32.mrf.mxu2  ;;  %2255 = vmatpush.bf16.msrb.mxu3 %v3496_v42 }
 0x1c7   :  { %v1641_v50 = vadd.f32 %v1640_v10, %v1628_v40  ;;  %2272 = vmatpush.bf16.msrb.mxu0 %v3500_v6  ;;  %v3556_v10 = vld [vmem:[%s5064_s6] ss:$0 sm:$0xff] }
 0x1c9   :  { %v1629_v39 = vpop.f32.mrf.mxu1 }
 0x1ca   :  { %2256 = vmatpush.bf16.msrb.mxu3 %v3495_v44 }
 0x1ce   :  { %v1642_v46 = vpop.f32.mrf.mxu2  ;;  %2257 = vmatpush.bf16.msrb.mxu3 %v3494_v47 }
 0x1d2   :  { %2258 = vmatpush.bf16.msrb.mxu3 %v3493_v49 }
 0x1d6   :  { %2259 = vmatpush.bf16.msrb.mxu3 %v3492_v38 }
 0x1dc   :  { %v1653_v22 = vpop.f32.mrf.mxu3 }
 0x1dd   :  { %v1654_v53 = vadd.f32 %v1653_v22, %v1641_v50 }
 0x1de   :  { %v1679_v51 = vpop.f32.mrf.mxu1 }
 0x1df   :  { %v1815_v54 = vmax.f32 %v1654_v53, 0.0  ;;  %v1680_v2 = vadd.f32 %v1679_v51, %v4799_v41  ;;  %v3514_v41 = vld [vmem:[%s5063_s5 + $0x170] sm:$0xff]  ;;  %s3583_s5 = smov [#allocation2]  }
 0x1e0   :  { %2279 = vmatpush.bf16.msra.mxu1 %v3514_v41  ;;  %s2297_s6 = sshll.u32 %s3583_s5, 4  ;;  %s2298_s6 = int_to_ptr.vmem [resolvable:$true] %s2297_s6 }
 0x1e1   :  { %v1821_v3 = vpack.c.bf16 %v1815_v54, %v1815_v54 }
 0x1e3   :  { %2247 = vmatmul.bf16.vlgmr.msrb.gmra.mxu2 %v1821_v3 }
 0x1e4   :  { %v1655_v59 = vpop.f32.mrf.mxu3  ;;  %2280 = vmatpush.bf16.msra.mxu1 %v3513_v14 }
 0x1e6   :  { %v1681_v57 = vpop.f32.mrf.mxu1  ;;  %v1692_v58 = vpop.f32.mrf.mxu2 }
 0x1e7   :  { %v1693_v4 = vadd.f32 %v1692_v58, %v1680_v2 }
 0x1e8   :  { %2281 = vmatpush.bf16.msra.mxu1 %v3512_v18 }
 0x1ec   :  { %2282 = vmatpush.bf16.msra.mxu1 %v3511_v19 }
 0x1ee   :  { %v1694_v63 = vpop.f32.mrf.mxu2 }
 0x1f0   :  { %2283 = vmatpush.bf16.msra.mxu1 %v3510_v23 }
 0x1f4   :  { %2284 = vmatpush.bf16.msra.mxu1 %v3509_v24 }
 0x1f8   :  { %2285 = vmatpush.bf16.msra.mxu1 %v3508_v28 }
 0x1fc   :  { %v1705_v7 = vpop.f32.mrf.mxu3 }
 0x1fd   :  { %v1706_v9 = vadd.f32 %v1705_v7, %v1693_v4 }
 0x1fe   :  { %v1731_v5 = vpop.f32.mrf.mxu1 }
 0x1ff   :  { %v1816_v11 = vmax.f32 %v1706_v9, 0.0  ;;  %v1732_v26 = vadd.f32 %v1731_v5, %v4888_v43 }
 0x201   :  { %v1822_v13 = vpack.c.bf16 %v1816_v11, %v1816_v11 }
 0x203   :  { %2260 = vmatmul.bf16.vlgmr.msrb.gmra.mxu3 %v1822_v13 }
 0x204   :  { %v1707_v17 = vpop.f32.mrf.mxu3 }
 0x206   :  { %v1733_v15 = vpop.f32.mrf.mxu1  ;;  %v1744_v16 = vpop.f32.mrf.mxu2 }
 0x207   :  { %v1745_v48 = vadd.f32 %v1744_v16, %v1732_v26 }
 0x20e   :  { %v1746_v21 = vpop.f32.mrf.mxu2 }
 0x21c   :  { %v1757_v29 = vpop.f32.mrf.mxu3 }
 0x21d   :  { %v1758_v30 = vadd.f32 %v1757_v29, %v1745_v48 }
 0x21e   :  { %v1783_v27 = vpop.f32.mrf.mxu1 }
 0x21f   :  { %v1817_v31 = vmax.f32 %v1758_v30, 0.0  ;;  %v1784_v43 = vadd.f32 %v1783_v27, %v4936_v60 }
 0x221   :  { %v1823_v20 = vpack.c.bf16 %v1817_v31, %v1817_v31 }
 0x223   :  { %2273 = vmatmul.bf16.vlgmr.msrb.gmra.mxu0 %v1823_v20 }
 0x224   :  { %v1759_v34 = vpop.f32.mrf.mxu3 }
 0x226   :  { %v1785_v32 = vpop.f32.mrf.mxu1  ;;  %v1796_v33 = vpop.f32.mrf.mxu2 }
 0x227   :  { %v1797_v39 = vadd.f32 %v1796_v33, %v1784_v43 }
 0x22a   :  { %v2222_v37 = vpop.f32.mrf.mxu0 }
 0x22b   :  { %v2223_v44 = vadd.f32 %v3556_v10, %v2222_v37 }
 0x22e   :  { %v1798_v35 = vpop.f32.mrf.mxu2 }
 0x232   :  { %v2224_v25 = vpop.f32.mrf.mxu0 }
 0x23c   :  { %v1809_v36 = vpop.f32.mrf.mxu3 }
 0x23d   :  { %v1810_v42 = vadd.f32 %v1809_v36, %v1797_v39 }
 0x23e   :  { %v2235_v45 = vpop.f32.mrf.mxu1 }
 0x23f   :  { %v1818_v46 = vmax.f32 %v1810_v42, 0.0  ;;  %v2236_v12 = vadd.f32 %v2235_v45, %v2223_v44 }
 0x241   :  { %v1824_v47 = vpack.c.bf16 %v1818_v46, %v1818_v46 }
 0x243   :  { %2286 = vmatmul.bf16.vlgmr.msra.gmra.mxu1 %v1824_v47 }
 0x244   :  { %v1811_v49 = vpop.f32.mrf.mxu3 }
 0x246   :  { %v2237_v40 = vpop.f32.mrf.mxu1 }
 0x266   :  { %v2248_v50 = vpop.f32.mrf.mxu2 }
 0x267   :  { %v2249_v51 = vadd.f32 %v2248_v50, %v2236_v12 }
 0x26e   :  { %v2250_v38 = vpop.f32.mrf.mxu2 }
 0x286   :  { %v2261_v22 = vpop.f32.mrf.mxu3 }
 0x287   :  { %v2262_v54 = vadd.f32 %v2261_v22, %v2249_v51 }
 0x28e   :  { %v2263_v60 = vpop.f32.mrf.mxu3 }
 0x2a0   :  { %v2274_v52 = vpop.f32.mrf.mxu0 }
 0x2a1   :  { %v2275_v55 = vadd.f32 %v2274_v52, %v2262_v54 }
 0x2a8   :  { %v2276_v53 = vpop.f32.mrf.mxu0 }
 0x2c0   :  { %v2287_v3 = vpop.f32.mrf.mxu1 }
 0x2c1   :  { %v2288_v56 = vadd.f32 %v2287_v3, %v2275_v55 }
 0x2c3   :  { %2291 = vst [vmem:[#allocation2] sm:$0x3] %v2288_v56 }
 0x2c4   :  { %2302 = dma.vmem_to_hbm [thread:$0]  %s2298_s6, 32, %s2300_s1, [#allocation3]  }
 0x2c8   :  { %v2289_v57 = vpop.f32.mrf.mxu1 }
 0x2c9   :  { %3581 = dma.done.wait [#allocation3], 32  }
 0x2ca   :  { %3582 = vsyncadd [#allocation3], 4294967264 }
 0x2cb   :  { %2307 = vsyncpa [#allocation3], 1 }

</bundles_post_ra>
